<compile_context>
chip_gen: v7x
topology: tpu7x:2x2x1
jax: 0.10.0
libtpu: 0.0.40
codegen_flags: <defaults>
</compile_context>

<pallas_src>
import functools

import jax
import jax.numpy as jnp
from jax.experimental import pallas as pl
from jax.experimental.pallas import tpu as pltpu


# --------------------------------------------------------------------------
# Fused kernel: conv1x1 projections + both cross-attentions + residual + LN.
# Single invocation (no grid); everything lives in VMEM.
# --------------------------------------------------------------------------
def fused_cross_modal_kernel(audio_ref, text_ref,          # activations
                             aw_ref, tw_ref, cb_ref,       # conv1x1 params
                             wq_ref, wk_ref, wv_ref, wo_ref,  # MHA weights
                             bin_ref, misc_ref,             # MHA biases + LN
                             o_ref, *, num_heads):
    B, S, Ca = audio_ref.shape
    Ct = text_ref.shape[2]
    P = aw_ref.shape[1]
    H = num_heads
    hd = P // H
    scale = 1.0 / float(hd) ** 0.5

    # ---- Pointwise Conv1d projections, computed ONCE for both directions. ----
    # bf16 operands into the MXU, f32 accumulation; elementwise math in f32.
    audio = audio_ref[...].reshape(B * S, Ca).astype(jnp.bfloat16)
    text = text_ref[...].reshape(B * S, Ct).astype(jnp.bfloat16)
    cb = cb_ref[...].astype(jnp.float32)                    # (2, P)
    a_proj = jnp.dot(audio, aw_ref[...].astype(jnp.bfloat16),
                     preferred_element_type=jnp.float32) + cb[0:1, :]
    t_proj = jnp.dot(text, tw_ref[...].astype(jnp.bfloat16),
                     preferred_element_type=jnp.float32) + cb[1:2, :]

    outs = []
    # Static (trace-time) unroll over the two directions:
    #   d = 0 (a2t): query/residual = text_proj, key/value = audio_proj
    #   d = 1 (t2a): query/residual = audio_proj, key/value = text_proj
    # No runtime blend / cond needed.
    for d in range(2):
        q_in = t_proj if d == 0 else a_proj                 # (B*S, P) f32
        kv_in = a_proj if d == 0 else t_proj                # (B*S, P) f32

        wq = wq_ref[d].astype(jnp.bfloat16)                 # (P, P)
        wk = wk_ref[d].astype(jnp.bfloat16)
        wv = wv_ref[d].astype(jnp.bfloat16)
        wo = wo_ref[d].astype(jnp.bfloat16)
        b_in = bin_ref[d].astype(jnp.float32)               # (3, P): [bq, bk, bv]
        misc = misc_ref[d].astype(jnp.float32)              # (3, P): [bo, gamma, beta]

        q_b = q_in.astype(jnp.bfloat16)
        kv_b = kv_in.astype(jnp.bfloat16)
        q = jnp.dot(q_b, wq, preferred_element_type=jnp.float32) + b_in[0:1, :]
        k = jnp.dot(kv_b, wk, preferred_element_type=jnp.float32) + b_in[1:2, :]
        v = jnp.dot(kv_b, wv, preferred_element_type=jnp.float32) + b_in[2:3, :]

        q3 = q.reshape(B, S, P).astype(jnp.bfloat16)
        k3 = k.reshape(B, S, P).astype(jnp.bfloat16)
        v3 = v.reshape(B, S, P).astype(jnp.bfloat16)

        # Per-head attention, batched over the batch dim via rank-3 einsums.
        # Softmax entirely in f32 (approx reciprocal on the EUP path; its
        # ~1e-3 relative error is below the bf16 matmul noise floor).
        ctx_heads = []
        for h in range(H):
            lo, hi = h * hd, (h + 1) * hd
            s = jnp.einsum('bqd,bkd->bqk', q3[:, :, lo:hi], k3[:, :, lo:hi],
                           preferred_element_type=jnp.float32) * scale
            s = s - jnp.max(s, axis=-1, keepdims=True)
            p = jnp.exp(s)
            p = p * pl.reciprocal(jnp.sum(p, axis=-1, keepdims=True), approx=True)
            ctx_heads.append(
                jnp.einsum('bqk,bkd->bqd', p.astype(jnp.bfloat16),
                           v3[:, :, lo:hi], preferred_element_type=jnp.float32))

        # ONE full-depth (B*S, P) @ (P, P) output projection instead of H
        # shallow K=hd matmuls.
        ctx = jnp.concatenate(ctx_heads, axis=-1).reshape(B * S, P)
        attn = jnp.dot(ctx.astype(jnp.bfloat16), wo,
                       preferred_element_type=jnp.float32) + misc[0:1, :]

        # Residual (on the query stream) + LayerNorm (eps=1e-5, affine), f32.
        res = q_in + attn
        mean = jnp.mean(res, axis=-1, keepdims=True)
        cen = res - mean
        var = jnp.mean(cen * cen, axis=-1, keepdims=True)
        out = cen * jax.lax.rsqrt(var + 1e-5) * misc[1:2, :] + misc[2:3, :]
        outs.append(out.reshape(B, S, P))

    # Single lane-dense store of the fused (B, S, 2P) result.
    o_ref[...] = jnp.concatenate(outs, axis=-1).astype(o_ref.dtype)


# --------------------------------------------------------------------------
# Wrapper: single grid-less pallas_call, output already in fused layout.
# --------------------------------------------------------------------------
def cross_modal_attention(audio_features, text_features, params, num_heads):
    B, S, Ca = audio_features.shape
    Bt, St, Ct = text_features.shape
    P = params["audio_w"].shape[1]
    assert (B, S) == (Bt, St), "kernel assumes equal audio/text batch & seq len"
    assert P % num_heads == 0, "projection_dim must be divisible by mhsa_heads"
    assert S % 8 == 0, "S must be a multiple of 8 so (B*S) folds stay views"
    # TODO(synk): support S_audio != S_text and non-multiple-of-8 S (pad S).

    flops = (2 * B * S * P * (Ca + Ct)                        # conv1x1 projections
             + 2 * (8 * B * S * P * P + 4 * B * S * S * P))   # qkv + attn + out, both dirs
    transcendentals = 2 * B * S * (S * num_heads + 2)         # exp + recip/rsqrt
    bytes_accessed = 4 * (B * S * (Ca + Ct)                   # inputs
                          + (Ca + Ct) * P + 2 * P             # conv params
                          + 8 * P * P + 12 * P                # attention params
                          + B * S * 2 * P)                    # output

    kernel = functools.partial(fused_cross_modal_kernel, num_heads=num_heads)
    vmem = pl.BlockSpec(memory_space=pltpu.MemorySpace.VMEM)  # whole array in VMEM
    return pl.pallas_call(
        kernel,
        out_shape=jax.ShapeDtypeStruct((B, S, 2 * P), audio_features.dtype),
        in_specs=[vmem] * 11,
        out_specs=vmem,
        compiler_params=pltpu.CompilerParams(vmem_limit_bytes=32 * 1024 * 1024),
        cost_estimate=pl.CostEstimate(flops=flops,
                                      transcendentals=transcendentals,
                                      bytes_accessed=bytes_accessed),
    )(audio_features, text_features,
      params["audio_w"], params["text_w"], params["conv_b"],
      params["w_q"], params["w_k"], params["w_v"], params["w_out"],
      params["b_in"], params["misc"])


# --------------------------------------------------------------------------
# Parameter construction (direction-stacked, lane-aligned layout).
# --------------------------------------------------------------------------
def init_params(key, audio_in_dim, text_in_dim, projection_dim):
    P = projection_dim
    ks = jax.random.split(key, 10)
    n = lambda k, shape: (0.02 * jax.random.normal(k, shape)).astype(jnp.float32)
    ones = jnp.ones((P,), jnp.float32)
    zeros = jnp.zeros((P,), jnp.float32)
    # TODO(synk): nn.MultiheadAttention attention-probability dropout is not
    # implemented (module default is dropout=0.0 / inference mode), and only
    # cnn_kernel_size=1 (the config default) is supported.
    return {
        # Conv1d(kernel_size=1) weights pre-transposed: (C_in, P) so y = x @ W + b
        "audio_w": n(ks[0], (audio_in_dim, P)),
        "text_w": n(ks[1], (text_in_dim, P)),
        "conv_b": n(ks[2], (2, P)),                        # rows: [audio_b, text_b]
        # Direction-stacked attention params (index 0 = a2t, 1 = t2a),
        # each pre-transposed so y = x @ W (lane-aligned, no packed slicing).
        "w_q": n(ks[3], (2, P, P)),
        "w_k": n(ks[4], (2, P, P)),
        "w_v": n(ks[5], (2, P, P)),
        "w_out": n(ks[6], (2, P, P)),
        "b_in": n(ks[7], (2, 3, P)),                       # rows: [bq, bk, bv]
        # misc rows: [out_proj bias, LayerNorm gamma (=1), LayerNorm beta (=0)]
        "misc": jnp.stack([
            jnp.stack([n(ks[8], (P,)), ones, zeros]),
            jnp.stack([n(ks[9], (P,)), ones, zeros]),
        ]),                                                # (2, 3, P)
    }


# --------------------------------------------------------------------------
# Pure-JAX reference (mirrors the PyTorch module semantics) for validation.
# --------------------------------------------------------------------------
def reference_forward(audio, text, params, H):
    P = params["audio_w"].shape[1]
    hd = P // H
    a_proj = audio @ params["audio_w"] + params["conv_b"][0]
    t_proj = text @ params["text_w"] + params["conv_b"][1]

    def mha_ln(q_in, kv_in, wq, wk, wv, wo, b_in, misc):
        B, S, _ = q_in.shape
        q = q_in @ wq + b_in[0]
        k = kv_in @ wk + b_in[1]
        v = kv_in @ wv + b_in[2]
        q = q.reshape(B, S, H, hd).transpose(0, 2, 1, 3)
        k = k.reshape(B, S, H, hd).transpose(0, 2, 1, 3)
        v = v.reshape(B, S, H, hd).transpose(0, 2, 1, 3)
        s = jnp.einsum('bhqd,bhkd->bhqk', q, k) / jnp.sqrt(float(hd))
        p = jax.nn.softmax(s, axis=-1)
        ctx = jnp.einsum('bhqk,bhkd->bhqd', p, v).transpose(0, 2, 1, 3).reshape(B, S, P)
        attn = ctx @ wo + misc[0]
        res = q_in + attn
        mean = res.mean(-1, keepdims=True)
        var = ((res - mean) ** 2).mean(-1, keepdims=True)
        return (res - mean) / jnp.sqrt(var + 1e-5) * misc[1] + misc[2]

    a2t = mha_ln(t_proj, a_proj, params["w_q"][0], params["w_k"][0],
                 params["w_v"][0], params["w_out"][0],
                 params["b_in"][0], params["misc"][0])
    t2a = mha_ln(a_proj, t_proj, params["w_q"][1], params["w_k"][1],
                 params["w_v"][1], params["w_out"][1],
                 params["b_in"][1], params["misc"][1])
    return jnp.concatenate([a2t, t2a], axis=-1)


if __name__ == "__main__":
    batch = 2
    seq_len = 8
    audio_in_dim = 32
    text_in_dim = 48
    projection_dim = 32
    mhsa_heads = 4

    key = jax.random.PRNGKey(0)
    k_a, k_t, k_p = jax.random.split(key, 3)
    audio_features = jax.random.normal(k_a, (batch, seq_len, audio_in_dim), jnp.float32)
    text_features = jax.random.normal(k_t, (batch, seq_len, text_in_dim), jnp.float32)
    params = init_params(k_p, audio_in_dim, text_in_dim, projection_dim)

    fusion = cross_modal_attention(audio_features, text_features, params, mhsa_heads)
    fusion = jax.block_until_ready(fusion)

    assert fusion.shape == (batch, seq_len, 2 * projection_dim), fusion.shape
    assert bool(jnp.all(jnp.isfinite(fusion)))

    ref = reference_forward(audio_features, text_features, params, mhsa_heads)
    # Tolerance sized for bf16 MXU operands with f32 accumulation.
    assert bool(jnp.allclose(fusion, ref, atol=2e-2, rtol=2e-2)), \
        float(jnp.max(jnp.abs(fusion - ref)))

    print("KERNEL_OK")
</pallas_src>

<mosaic_0001>
module attributes {stable_mosaic.version = 11 : i64} {
  func.func @fused_cross_modal_kernel(%arg0: memref<2x8x32xf32, #tpu.memory_space<vmem>>, %arg1: memref<2x8x48xf32, #tpu.memory_space<vmem>>, %arg2: memref<32x32xf32, #tpu.memory_space<vmem>>, %arg3: memref<48x32xf32, #tpu.memory_space<vmem>>, %arg4: memref<2x32xf32, #tpu.memory_space<vmem>>, %arg5: memref<2x32x32xf32, #tpu.memory_space<vmem>>, %arg6: memref<2x32x32xf32, #tpu.memory_space<vmem>>, %arg7: memref<2x32x32xf32, #tpu.memory_space<vmem>>, %arg8: memref<2x32x32xf32, #tpu.memory_space<vmem>>, %arg9: memref<2x3x32xf32, #tpu.memory_space<vmem>>, %arg10: memref<2x3x32xf32, #tpu.memory_space<vmem>>, %arg11: memref<2x8x64xf32, #tpu.memory_space<vmem>>) attributes {dimension_semantics = [], scalar_prefetch = 0 : i64, scratch_operands = 0 : i64, tpu.core_type = #tpu.core_type<tc>} {
    %c0 = arith.constant 0 : index
    %c0_0 = arith.constant 0 : index
    %c0_1 = arith.constant 0 : index
    %0 = vector.load %arg0[%c0, %c0_0, %c0_1] : memref<2x8x32xf32, #tpu.memory_space<vmem>>, vector<2x8x32xf32>
    %1 = vector.shape_cast %0 : vector<2x8x32xf32> to vector<16x32xf32>
    %2 = arith.truncf %1 : vector<16x32xf32> to vector<16x32xbf16>
    %c0_2 = arith.constant 0 : index
    %c0_3 = arith.constant 0 : index
    %c0_4 = arith.constant 0 : index
    %3 = vector.load %arg1[%c0_2, %c0_3, %c0_4] : memref<2x8x48xf32, #tpu.memory_space<vmem>>, vector<2x8x48xf32>
    %4 = vector.shape_cast %3 : vector<2x8x48xf32> to vector<16x48xf32>
    %5 = arith.truncf %4 : vector<16x48xf32> to vector<16x48xbf16>
    %c0_5 = arith.constant 0 : index
    %c0_6 = arith.constant 0 : index
    %6 = vector.load %arg4[%c0_5, %c0_6] : memref<2x32xf32, #tpu.memory_space<vmem>>, vector<2x32xf32>
    %c0_7 = arith.constant 0 : index
    %c0_8 = arith.constant 0 : index
    %7 = vector.load %arg2[%c0_7, %c0_8] : memref<32x32xf32, #tpu.memory_space<vmem>>, vector<32x32xf32>
    %8 = arith.truncf %7 : vector<32x32xf32> to vector<32x32xbf16>
    %cst = arith.constant dense<0.000000e+00> : vector<16x32xf32>
    %9 = tpu.matmul %2, %8, %cst {dimension_numbers = #tpu.dot_dimension_numbers<[1], [0], [0], [1], [0, 0, 1, 1], [], []>} : vector<16x32xbf16>, vector<32x32xbf16>, vector<16x32xf32> -> vector<16x32xf32>
    %10 = vector.extract_strided_slice %6 {offsets = [0, 0], sizes = [1, 32], strides = [1, 1]} : vector<2x32xf32> to vector<1x32xf32>
    %11 = vector.broadcast %10 : vector<1x32xf32> to vector<16x32xf32>
    %12 = arith.addf %9, %11 : vector<16x32xf32>
    %c0_9 = arith.constant 0 : index
    %c0_10 = arith.constant 0 : index
    %13 = vector.load %arg3[%c0_9, %c0_10] : memref<48x32xf32, #tpu.memory_space<vmem>>, vector<48x32xf32>
    %14 = arith.truncf %13 : vector<48x32xf32> to vector<48x32xbf16>
    %cst_11 = arith.constant dense<0.000000e+00> : vector<16x32xf32>
    %15 = tpu.matmul %5, %14, %cst_11 {dimension_numbers = #tpu.dot_dimension_numbers<[1], [0], [0], [1], [0, 0, 1, 1], [], []>} : vector<16x48xbf16>, vector<48x32xbf16>, vector<16x32xf32> -> vector<16x32xf32>
    %16 = vector.extract_strided_slice %6 {offsets = [1, 0], sizes = [1, 32], strides = [1, 1]} : vector<2x32xf32> to vector<1x32xf32>
    %17 = vector.broadcast %16 : vector<1x32xf32> to vector<16x32xf32>
    %18 = arith.addf %15, %17 : vector<16x32xf32>
    %c0_12 = arith.constant 0 : index
    %c0_13 = arith.constant 0 : index
    %c0_14 = arith.constant 0 : index
    %19 = vector.load %arg5[%c0_12, %c0_13, %c0_14] : memref<2x32x32xf32, #tpu.memory_space<vmem>>, vector<1x32x32xf32>
    %20 = vector.shape_cast %19 : vector<1x32x32xf32> to vector<32x32xf32>
    %21 = arith.truncf %20 : vector<32x32xf32> to vector<32x32xbf16>
    %c0_15 = arith.constant 0 : index
    %c0_16 = arith.constant 0 : index
    %c0_17 = arith.constant 0 : index
    %22 = vector.load %arg6[%c0_15, %c0_16, %c0_17] : memref<2x32x32xf32, #tpu.memory_space<vmem>>, vector<1x32x32xf32>
    %23 = vector.shape_cast %22 : vector<1x32x32xf32> to vector<32x32xf32>
    %24 = arith.truncf %23 : vector<32x32xf32> to vector<32x32xbf16>
    %c0_18 = arith.constant 0 : index
    %c0_19 = arith.constant 0 : index
    %c0_20 = arith.constant 0 : index
    %25 = vector.load %arg7[%c0_18, %c0_19, %c0_20] : memref<2x32x32xf32, #tpu.memory_space<vmem>>, vector<1x32x32xf32>
    %26 = vector.shape_cast %25 : vector<1x32x32xf32> to vector<32x32xf32>
    %27 = arith.truncf %26 : vector<32x32xf32> to vector<32x32xbf16>
    %c0_21 = arith.constant 0 : index
    %c0_22 = arith.constant 0 : index
    %c0_23 = arith.constant 0 : index
    %28 = vector.load %arg8[%c0_21, %c0_22, %c0_23] : memref<2x32x32xf32, #tpu.memory_space<vmem>>, vector<1x32x32xf32>
    %29 = vector.shape_cast %28 : vector<1x32x32xf32> to vector<32x32xf32>
    %30 = arith.truncf %29 : vector<32x32xf32> to vector<32x32xbf16>
    %c0_24 = arith.constant 0 : index
    %c0_25 = arith.constant 0 : index
    %c0_26 = arith.constant 0 : index
    %31 = vector.load %arg9[%c0_24, %c0_25, %c0_26] : memref<2x3x32xf32, #tpu.memory_space<vmem>>, vector<1x3x32xf32>
    %32 = vector.shape_cast %31 : vector<1x3x32xf32> to vector<3x32xf32>
    %c0_27 = arith.constant 0 : index
    %c0_28 = arith.constant 0 : index
    %c0_29 = arith.constant 0 : index
    %33 = vector.load %arg10[%c0_27, %c0_28, %c0_29] : memref<2x3x32xf32, #tpu.memory_space<vmem>>, vector<1x3x32xf32>
    %34 = vector.shape_cast %33 : vector<1x3x32xf32> to vector<3x32xf32>
    %35 = arith.truncf %18 : vector<16x32xf32> to vector<16x32xbf16>
    %36 = arith.truncf %12 : vector<16x32xf32> to vector<16x32xbf16>
    %cst_30 = arith.constant dense<0.000000e+00> : vector<16x32xf32>
    %37 = tpu.matmul %35, %21, %cst_30 {dimension_numbers = #tpu.dot_dimension_numbers<[1], [0], [0], [1], [0, 0, 1, 1], [], []>} : vector<16x32xbf16>, vector<32x32xbf16>, vector<16x32xf32> -> vector<16x32xf32>
    %38 = vector.extract_strided_slice %32 {offsets = [0, 0], sizes = [1, 32], strides = [1, 1]} : vector<3x32xf32> to vector<1x32xf32>
    %39 = vector.broadcast %38 : vector<1x32xf32> to vector<16x32xf32>
    %40 = arith.addf %37, %39 : vector<16x32xf32>
    %cst_31 = arith.constant dense<0.000000e+00> : vector<16x32xf32>
    %41 = tpu.matmul %36, %24, %cst_31 {dimension_numbers = #tpu.dot_dimension_numbers<[1], [0], [0], [1], [0, 0, 1, 1], [], []>} : vector<16x32xbf16>, vector<32x32xbf16>, vector<16x32xf32> -> vector<16x32xf32>
    %42 = vector.extract_strided_slice %32 {offsets = [1, 0], sizes = [1, 32], strides = [1, 1]} : vector<3x32xf32> to vector<1x32xf32>
    %43 = vector.broadcast %42 : vector<1x32xf32> to vector<16x32xf32>
    %44 = arith.addf %41, %43 : vector<16x32xf32>
    %cst_32 = arith.constant dense<0.000000e+00> : vector<16x32xf32>
    %45 = tpu.matmul %36, %27, %cst_32 {dimension_numbers = #tpu.dot_dimension_numbers<[1], [0], [0], [1], [0, 0, 1, 1], [], []>} : vector<16x32xbf16>, vector<32x32xbf16>, vector<16x32xf32> -> vector<16x32xf32>
    %46 = vector.extract_strided_slice %32 {offsets = [2, 0], sizes = [1, 32], strides = [1, 1]} : vector<3x32xf32> to vector<1x32xf32>
    %47 = vector.broadcast %46 : vector<1x32xf32> to vector<16x32xf32>
    %48 = arith.addf %45, %47 : vector<16x32xf32>
    %49 = vector.shape_cast %40 : vector<16x32xf32> to vector<2x8x32xf32>
    %50 = arith.truncf %49 : vector<2x8x32xf32> to vector<2x8x32xbf16>
    %51 = vector.shape_cast %44 : vector<16x32xf32> to vector<2x8x32xf32>
    %52 = arith.truncf %51 : vector<2x8x32xf32> to vector<2x8x32xbf16>
    %53 = vector.shape_cast %48 : vector<16x32xf32> to vector<2x8x32xf32>
    %54 = arith.truncf %53 : vector<2x8x32xf32> to vector<2x8x32xbf16>
    %55 = vector.extract_strided_slice %50 {offsets = [0, 0, 0], sizes = [2, 8, 8], strides = [1, 1, 1]} : vector<2x8x32xbf16> to vector<2x8x8xbf16>
    %56 = vector.extract_strided_slice %52 {offsets = [0, 0, 0], sizes = [2, 8, 8], strides = [1, 1, 1]} : vector<2x8x32xbf16> to vector<2x8x8xbf16>
    "tpu.trace_start"() <{level = 10 : i32, message = "bqd,bkd->bqk"}> : () -> ()
    %cst_33 = arith.constant dense<0.000000e+00> : vector<2x8x8xf32>
    %57 = tpu.matmul %55, %56, %cst_33 {dimension_numbers = #tpu.dot_dimension_numbers<[2], [2], [1], [1], [0, 0, 0, 1, 1, 1], [0], [0]>} : vector<2x8x8xbf16>, vector<2x8x8xbf16>, vector<2x8x8xf32> -> vector<2x8x8xf32>
    "tpu.trace_stop"() : () -> ()
    %cst_34 = arith.constant 0.353553385 : f32
    %58 = vector.broadcast %cst_34 : f32 to vector<2x8x8xf32>
    %59 = arith.mulf %57, %58 : vector<2x8x8xf32>
    %cst_35 = arith.constant dense<0xFF800000> : vector<2x8xf32>
    %60 = vector.multi_reduction <maximumf>, %59, %cst_35 [2] : vector<2x8x8xf32> to vector<2x8xf32>
    %61 = vector.shape_cast %60 : vector<2x8xf32> to vector<2x8x1xf32>
    %62 = vector.broadcast %61 : vector<2x8x1xf32> to vector<2x8x8xf32>
    %63 = arith.subf %59, %62 : vector<2x8x8xf32>
    %64 = math.exp %63 : vector<2x8x8xf32>
    %cst_36 = arith.constant dense<0.000000e+00> : vector<2x8xf32>
    %65 = vector.multi_reduction <add>, %64, %cst_36 [2] : vector<2x8x8xf32> to vector<2x8xf32>
    %66 = vector.shape_cast %65 : vector<2x8xf32> to vector<2x8x1xf32>
    %67 = tpu.reciprocal %66 {approx = true} : vector<2x8x1xf32> -> vector<2x8x1xf32>
    %68 = vector.broadcast %67 : vector<2x8x1xf32> to vector<2x8x8xf32>
    %69 = arith.mulf %64, %68 : vector<2x8x8xf32>
    %70 = arith.truncf %69 : vector<2x8x8xf32> to vector<2x8x8xbf16>
    %71 = vector.extract_strided_slice %54 {offsets = [0, 0, 0], sizes = [2, 8, 8], strides = [1, 1, 1]} : vector<2x8x32xbf16> to vector<2x8x8xbf16>
    "tpu.trace_start"() <{level = 10 : i32, message = "bqk,bkd->bqd"}> : () -> ()
    %cst_37 = arith.constant dense<0.000000e+00> : vector<2x8x8xf32>
    %72 = tpu.matmul %70, %71, %cst_37 {dimension_numbers = #tpu.dot_dimension_numbers<[2], [1], [1], [2], [0, 0, 0, 1, 1, 2], [0], [0]>} : vector<2x8x8xbf16>, vector<2x8x8xbf16>, vector<2x8x8xf32> -> vector<2x8x8xf32>
    "tpu.trace_stop"() : () -> ()
    %73 = vector.extract_strided_slice %50 {offsets = [0, 0, 8], sizes = [2, 8, 8], strides = [1, 1, 1]} : vector<2x8x32xbf16> to vector<2x8x8xbf16>
    %74 = vector.extract_strided_slice %52 {offsets = [0, 0, 8], sizes = [2, 8, 8], strides = [1, 1, 1]} : vector<2x8x32xbf16> to vector<2x8x8xbf16>
    "tpu.trace_start"() <{level = 10 : i32, message = "bqd,bkd->bqk"}> : () -> ()
    %cst_38 = arith.constant dense<0.000000e+00> : vector<2x8x8xf32>
    %75 = tpu.matmul %73, %74, %cst_38 {dimension_numbers = #tpu.dot_dimension_numbers<[2], [2], [1], [1], [0, 0, 0, 1, 1, 1], [0], [0]>} : vector<2x8x8xbf16>, vector<2x8x8xbf16>, vector<2x8x8xf32> -> vector<2x8x8xf32>
    "tpu.trace_stop"() : () -> ()
    %cst_39 = arith.constant 0.353553385 : f32
    %76 = vector.broadcast %cst_39 : f32 to vector<2x8x8xf32>
    %77 = arith.mulf %75, %76 : vector<2x8x8xf32>
    %cst_40 = arith.constant dense<0xFF800000> : vector<2x8xf32>
    %78 = vector.multi_reduction <maximumf>, %77, %cst_40 [2] : vector<2x8x8xf32> to vector<2x8xf32>
    %79 = vector.shape_cast %78 : vector<2x8xf32> to vector<2x8x1xf32>
    %80 = vector.broadcast %79 : vector<2x8x1xf32> to vector<2x8x8xf32>
    %81 = arith.subf %77, %80 : vector<2x8x8xf32>
    %82 = math.exp %81 : vector<2x8x8xf32>
    %cst_41 = arith.constant dense<0.000000e+00> : vector<2x8xf32>
    %83 = vector.multi_reduction <add>, %82, %cst_41 [2] : vector<2x8x8xf32> to vector<2x8xf32>
    %84 = vector.shape_cast %83 : vector<2x8xf32> to vector<2x8x1xf32>
    %85 = tpu.reciprocal %84 {approx = true} : vector<2x8x1xf32> -> vector<2x8x1xf32>
    %86 = vector.broadcast %85 : vector<2x8x1xf32> to vector<2x8x8xf32>
    %87 = arith.mulf %82, %86 : vector<2x8x8xf32>
    %88 = arith.truncf %87 : vector<2x8x8xf32> to vector<2x8x8xbf16>
    %89 = vector.extract_strided_slice %54 {offsets = [0, 0, 8], sizes = [2, 8, 8], strides = [1, 1, 1]} : vector<2x8x32xbf16> to vector<2x8x8xbf16>
    "tpu.trace_start"() <{level = 10 : i32, message = "bqk,bkd->bqd"}> : () -> ()
    %cst_42 = arith.constant dense<0.000000e+00> : vector<2x8x8xf32>
    %90 = tpu.matmul %88, %89, %cst_42 {dimension_numbers = #tpu.dot_dimension_numbers<[2], [1], [1], [2], [0, 0, 0, 1, 1, 2], [0], [0]>} : vector<2x8x8xbf16>, vector<2x8x8xbf16>, vector<2x8x8xf32> -> vector<2x8x8xf32>
    "tpu.trace_stop"() : () -> ()
    %91 = vector.extract_strided_slice %50 {offsets = [0, 0, 16], sizes = [2, 8, 8], strides = [1, 1, 1]} : vector<2x8x32xbf16> to vector<2x8x8xbf16>
    %92 = vector.extract_strided_slice %52 {offsets = [0, 0, 16], sizes = [2, 8, 8], strides = [1, 1, 1]} : vector<2x8x32xbf16> to vector<2x8x8xbf16>
    "tpu.trace_start"() <{level = 10 : i32, message = "bqd,bkd->bqk"}> : () -> ()
    %cst_43 = arith.constant dense<0.000000e+00> : vector<2x8x8xf32>
    %93 = tpu.matmul %91, %92, %cst_43 {dimension_numbers = #tpu.dot_dimension_numbers<[2], [2], [1], [1], [0, 0, 0, 1, 1, 1], [0], [0]>} : vector<2x8x8xbf16>, vector<2x8x8xbf16>, vector<2x8x8xf32> -> vector<2x8x8xf32>
    "tpu.trace_stop"() : () -> ()
    %cst_44 = arith.constant 0.353553385 : f32
    %94 = vector.broadcast %cst_44 : f32 to vector<2x8x8xf32>
    %95 = arith.mulf %93, %94 : vector<2x8x8xf32>
    %cst_45 = arith.constant dense<0xFF800000> : vector<2x8xf32>
    %96 = vector.multi_reduction <maximumf>, %95, %cst_45 [2] : vector<2x8x8xf32> to vector<2x8xf32>
    %97 = vector.shape_cast %96 : vector<2x8xf32> to vector<2x8x1xf32>
    %98 = vector.broadcast %97 : vector<2x8x1xf32> to vector<2x8x8xf32>
    %99 = arith.subf %95, %98 : vector<2x8x8xf32>
    %100 = math.exp %99 : vector<2x8x8xf32>
    %cst_46 = arith.constant dense<0.000000e+00> : vector<2x8xf32>
    %101 = vector.multi_reduction <add>, %100, %cst_46 [2] : vector<2x8x8xf32> to vector<2x8xf32>
    %102 = vector.shape_cast %101 : vector<2x8xf32> to vector<2x8x1xf32>
    %103 = tpu.reciprocal %102 {approx = true} : vector<2x8x1xf32> -> vector<2x8x1xf32>
    %104 = vector.broadcast %103 : vector<2x8x1xf32> to vector<2x8x8xf32>
    %105 = arith.mulf %100, %104 : vector<2x8x8xf32>
    %106 = arith.truncf %105 : vector<2x8x8xf32> to vector<2x8x8xbf16>
    %107 = vector.extract_strided_slice %54 {offsets = [0, 0, 16], sizes = [2, 8, 8], strides = [1, 1, 1]} : vector<2x8x32xbf16> to vector<2x8x8xbf16>
    "tpu.trace_start"() <{level = 10 : i32, message = "bqk,bkd->bqd"}> : () -> ()
    %cst_47 = arith.constant dense<0.000000e+00> : vector<2x8x8xf32>
    %108 = tpu.matmul %106, %107, %cst_47 {dimension_numbers = #tpu.dot_dimension_numbers<[2], [1], [1], [2], [0, 0, 0, 1, 1, 2], [0], [0]>} : vector<2x8x8xbf16>, vector<2x8x8xbf16>, vector<2x8x8xf32> -> vector<2x8x8xf32>
    "tpu.trace_stop"() : () -> ()
    %109 = vector.extract_strided_slice %50 {offsets = [0, 0, 24], sizes = [2, 8, 8], strides = [1, 1, 1]} : vector<2x8x32xbf16> to vector<2x8x8xbf16>
    %110 = vector.extract_strided_slice %52 {offsets = [0, 0, 24], sizes = [2, 8, 8], strides = [1, 1, 1]} : vector<2x8x32xbf16> to vector<2x8x8xbf16>
    "tpu.trace_start"() <{level = 10 : i32, message = "bqd,bkd->bqk"}> : () -> ()
    %cst_48 = arith.constant dense<0.000000e+00> : vector<2x8x8xf32>
    %111 = tpu.matmul %109, %110, %cst_48 {dimension_numbers = #tpu.dot_dimension_numbers<[2], [2], [1], [1], [0, 0, 0, 1, 1, 1], [0], [0]>} : vector<2x8x8xbf16>, vector<2x8x8xbf16>, vector<2x8x8xf32> -> vector<2x8x8xf32>
    "tpu.trace_stop"() : () -> ()
    %cst_49 = arith.constant 0.353553385 : f32
    %112 = vector.broadcast %cst_49 : f32 to vector<2x8x8xf32>
    %113 = arith.mulf %111, %112 : vector<2x8x8xf32>
    %cst_50 = arith.constant dense<0xFF800000> : vector<2x8xf32>
    %114 = vector.multi_reduction <maximumf>, %113, %cst_50 [2] : vector<2x8x8xf32> to vector<2x8xf32>
    %115 = vector.shape_cast %114 : vector<2x8xf32> to vector<2x8x1xf32>
    %116 = vector.broadcast %115 : vector<2x8x1xf32> to vector<2x8x8xf32>
    %117 = arith.subf %113, %116 : vector<2x8x8xf32>
    %118 = math.exp %117 : vector<2x8x8xf32>
    %cst_51 = arith.constant dense<0.000000e+00> : vector<2x8xf32>
    %119 = vector.multi_reduction <add>, %118, %cst_51 [2] : vector<2x8x8xf32> to vector<2x8xf32>
    %120 = vector.shape_cast %119 : vector<2x8xf32> to vector<2x8x1xf32>
    %121 = tpu.reciprocal %120 {approx = true} : vector<2x8x1xf32> -> vector<2x8x1xf32>
    %122 = vector.broadcast %121 : vector<2x8x1xf32> to vector<2x8x8xf32>
    %123 = arith.mulf %118, %122 : vector<2x8x8xf32>
    %124 = arith.truncf %123 : vector<2x8x8xf32> to vector<2x8x8xbf16>
    %125 = vector.extract_strided_slice %54 {offsets = [0, 0, 24], sizes = [2, 8, 8], strides = [1, 1, 1]} : vector<2x8x32xbf16> to vector<2x8x8xbf16>
    "tpu.trace_start"() <{level = 10 : i32, message = "bqk,bkd->bqd"}> : () -> ()
    %cst_52 = arith.constant dense<0.000000e+00> : vector<2x8x8xf32>
    %126 = tpu.matmul %124, %125, %cst_52 {dimension_numbers = #tpu.dot_dimension_numbers<[2], [1], [1], [2], [0, 0, 0, 1, 1, 2], [0], [0]>} : vector<2x8x8xbf16>, vector<2x8x8xbf16>, vector<2x8x8xf32> -> vector<2x8x8xf32>
    "tpu.trace_stop"() : () -> ()
    %127 = tpu.concatenate %72, %90, %108, %126 in 2 : vector<2x8x8xf32>, vector<2x8x8xf32>, vector<2x8x8xf32>, vector<2x8x8xf32> -> vector<2x8x32xf32>
    %128 = vector.shape_cast %127 : vector<2x8x32xf32> to vector<16x32xf32>
    %129 = arith.truncf %128 : vector<16x32xf32> to vector<16x32xbf16>
    %cst_53 = arith.constant dense<0.000000e+00> : vector<16x32xf32>
    %130 = tpu.matmul %129, %30, %cst_53 {dimension_numbers = #tpu.dot_dimension_numbers<[1], [0], [0], [1], [0, 0, 1, 1], [], []>} : vector<16x32xbf16>, vector<32x32xbf16>, vector<16x32xf32> -> vector<16x32xf32>
    %131 = vector.extract_strided_slice %34 {offsets = [0, 0], sizes = [1, 32], strides = [1, 1]} : vector<3x32xf32> to vector<1x32xf32>
    %132 = vector.broadcast %131 : vector<1x32xf32> to vector<16x32xf32>
    %133 = arith.addf %130, %132 : vector<16x32xf32>
    %134 = arith.addf %18, %133 : vector<16x32xf32>
    %cst_54 = arith.constant dense<0.000000e+00> : vector<16xf32>
    %135 = vector.multi_reduction <add>, %134, %cst_54 [1] : vector<16x32xf32> to vector<16xf32>
    %136 = vector.shape_cast %135 : vector<16xf32> to vector<16x1xf32>
    %cst_55 = arith.constant 3.200000e+01 : f32
    %137 = vector.broadcast %cst_55 : f32 to vector<16x1xf32>
    %138 = arith.divf %136, %137 : vector<16x1xf32>
    %139 = vector.broadcast %138 : vector<16x1xf32> to vector<16x32xf32>
    %140 = arith.subf %134, %139 : vector<16x32xf32>
    %141 = arith.mulf %140, %140 : vector<16x32xf32>
    %cst_56 = arith.constant dense<0.000000e+00> : vector<16xf32>
    %142 = vector.multi_reduction <add>, %141, %cst_56 [1] : vector<16x32xf32> to vector<16xf32>
    %143 = vector.shape_cast %142 : vector<16xf32> to vector<16x1xf32>
    %cst_57 = arith.constant 3.200000e+01 : f32
    %144 = vector.broadcast %cst_57 : f32 to vector<16x1xf32>
    %145 = arith.divf %143, %144 : vector<16x1xf32>
    %cst_58 = arith.constant 9.99999974E-6 : f32
    %146 = vector.broadcast %cst_58 : f32 to vector<16x1xf32>
    %147 = arith.addf %145, %146 : vector<16x1xf32>
    %148 = math.rsqrt %147 : vector<16x1xf32>
    %149 = vector.broadcast %148 : vector<16x1xf32> to vector<16x32xf32>
    %150 = arith.mulf %140, %149 : vector<16x32xf32>
    %151 = vector.extract_strided_slice %34 {offsets = [1, 0], sizes = [1, 32], strides = [1, 1]} : vector<3x32xf32> to vector<1x32xf32>
    %152 = vector.broadcast %151 : vector<1x32xf32> to vector<16x32xf32>
    %153 = arith.mulf %150, %152 : vector<16x32xf32>
    %154 = vector.extract_strided_slice %34 {offsets = [2, 0], sizes = [1, 32], strides = [1, 1]} : vector<3x32xf32> to vector<1x32xf32>
    %155 = vector.broadcast %154 : vector<1x32xf32> to vector<16x32xf32>
    %156 = arith.addf %153, %155 : vector<16x32xf32>
    %157 = vector.shape_cast %156 : vector<16x32xf32> to vector<2x8x32xf32>
    %c1 = arith.constant 1 : index
    %c0_59 = arith.constant 0 : index
    %c0_60 = arith.constant 0 : index
    %158 = vector.load %arg5[%c1, %c0_59, %c0_60] : memref<2x32x32xf32, #tpu.memory_space<vmem>>, vector<1x32x32xf32>
    %159 = vector.shape_cast %158 : vector<1x32x32xf32> to vector<32x32xf32>
    %160 = arith.truncf %159 : vector<32x32xf32> to vector<32x32xbf16>
    %c1_61 = arith.constant 1 : index
    %c0_62 = arith.constant 0 : index
    %c0_63 = arith.constant 0 : index
    %161 = vector.load %arg6[%c1_61, %c0_62, %c0_63] : memref<2x32x32xf32, #tpu.memory_space<vmem>>, vector<1x32x32xf32>
    %162 = vector.shape_cast %161 : vector<1x32x32xf32> to vector<32x32xf32>
    %163 = arith.truncf %162 : vector<32x32xf32> to vector<32x32xbf16>
    %c1_64 = arith.constant 1 : index
    %c0_65 = arith.constant 0 : index
    %c0_66 = arith.constant 0 : index
    %164 = vector.load %arg7[%c1_64, %c0_65, %c0_66] : memref<2x32x32xf32, #tpu.memory_space<vmem>>, vector<1x32x32xf32>
    %165 = vector.shape_cast %164 : vector<1x32x32xf32> to vector<32x32xf32>
    %166 = arith.truncf %165 : vector<32x32xf32> to vector<32x32xbf16>
    %c1_67 = arith.constant 1 : index
    %c0_68 = arith.constant 0 : index
    %c0_69 = arith.constant 0 : index
    %167 = vector.load %arg8[%c1_67, %c0_68, %c0_69] : memref<2x32x32xf32, #tpu.memory_space<vmem>>, vector<1x32x32xf32>
    %168 = vector.shape_cast %167 : vector<1x32x32xf32> to vector<32x32xf32>
    %169 = arith.truncf %168 : vector<32x32xf32> to vector<32x32xbf16>
    %c1_70 = arith.constant 1 : index
    %c0_71 = arith.constant 0 : index
    %c0_72 = arith.constant 0 : index
    %170 = vector.load %arg9[%c1_70, %c0_71, %c0_72] : memref<2x3x32xf32, #tpu.memory_space<vmem>>, vector<1x3x32xf32>
    %171 = vector.shape_cast %170 : vector<1x3x32xf32> to vector<3x32xf32>
    %c1_73 = arith.constant 1 : index
    %c0_74 = arith.constant 0 : index
    %c0_75 = arith.constant 0 : index
    %172 = vector.load %arg10[%c1_73, %c0_74, %c0_75] : memref<2x3x32xf32, #tpu.memory_space<vmem>>, vector<1x3x32xf32>
    %173 = vector.shape_cast %172 : vector<1x3x32xf32> to vector<3x32xf32>
    %174 = arith.truncf %12 : vector<16x32xf32> to vector<16x32xbf16>
    %175 = arith.truncf %18 : vector<16x32xf32> to vector<16x32xbf16>
    %cst_76 = arith.constant dense<0.000000e+00> : vector<16x32xf32>
    %176 = tpu.matmul %174, %160, %cst_76 {dimension_numbers = #tpu.dot_dimension_numbers<[1], [0], [0], [1], [0, 0, 1, 1], [], []>} : vector<16x32xbf16>, vector<32x32xbf16>, vector<16x32xf32> -> vector<16x32xf32>
    %177 = vector.extract_strided_slice %171 {offsets = [0, 0], sizes = [1, 32], strides = [1, 1]} : vector<3x32xf32> to vector<1x32xf32>
    %178 = vector.broadcast %177 : vector<1x32xf32> to vector<16x32xf32>
    %179 = arith.addf %176, %178 : vector<16x32xf32>
    %cst_77 = arith.constant dense<0.000000e+00> : vector<16x32xf32>
    %180 = tpu.matmul %175, %163, %cst_77 {dimension_numbers = #tpu.dot_dimension_numbers<[1], [0], [0], [1], [0, 0, 1, 1], [], []>} : vector<16x32xbf16>, vector<32x32xbf16>, vector<16x32xf32> -> vector<16x32xf32>
    %181 = vector.extract_strided_slice %171 {offsets = [1, 0], sizes = [1, 32], strides = [1, 1]} : vector<3x32xf32> to vector<1x32xf32>
    %182 = vector.broadcast %181 : vector<1x32xf32> to vector<16x32xf32>
    %183 = arith.addf %180, %182 : vector<16x32xf32>
    %cst_78 = arith.constant dense<0.000000e+00> : vector<16x32xf32>
    %184 = tpu.matmul %175, %166, %cst_78 {dimension_numbers = #tpu.dot_dimension_numbers<[1], [0], [0], [1], [0, 0, 1, 1], [], []>} : vector<16x32xbf16>, vector<32x32xbf16>, vector<16x32xf32> -> vector<16x32xf32>
    %185 = vector.extract_strided_slice %171 {offsets = [2, 0], sizes = [1, 32], strides = [1, 1]} : vector<3x32xf32> to vector<1x32xf32>
    %186 = vector.broadcast %185 : vector<1x32xf32> to vector<16x32xf32>
    %187 = arith.addf %184, %186 : vector<16x32xf32>
    %188 = vector.shape_cast %179 : vector<16x32xf32> to vector<2x8x32xf32>
    %189 = arith.truncf %188 : vector<2x8x32xf32> to vector<2x8x32xbf16>
    %190 = vector.shape_cast %183 : vector<16x32xf32> to vector<2x8x32xf32>
    %191 = arith.truncf %190 : vector<2x8x32xf32> to vector<2x8x32xbf16>
    %192 = vector.shape_cast %187 : vector<16x32xf32> to vector<2x8x32xf32>
    %193 = arith.truncf %192 : vector<2x8x32xf32> to vector<2x8x32xbf16>
    %194 = vector.extract_strided_slice %189 {offsets = [0, 0, 0], sizes = [2, 8, 8], strides = [1, 1, 1]} : vector<2x8x32xbf16> to vector<2x8x8xbf16>
    %195 = vector.extract_strided_slice %191 {offsets = [0, 0, 0], sizes = [2, 8, 8], strides = [1, 1, 1]} : vector<2x8x32xbf16> to vector<2x8x8xbf16>
    "tpu.trace_start"() <{level = 10 : i32, message = "bqd,bkd->bqk"}> : () -> ()
    %cst_79 = arith.constant dense<0.000000e+00> : vector<2x8x8xf32>
    %196 = tpu.matmul %194, %195, %cst_79 {dimension_numbers = #tpu.dot_dimension_numbers<[2], [2], [1], [1], [0, 0, 0, 1, 1, 1], [0], [0]>} : vector<2x8x8xbf16>, vector<2x8x8xbf16>, vector<2x8x8xf32> -> vector<2x8x8xf32>
    "tpu.trace_stop"() : () -> ()
    %cst_80 = arith.constant 0.353553385 : f32
    %197 = vector.broadcast %cst_80 : f32 to vector<2x8x8xf32>
    %198 = arith.mulf %196, %197 : vector<2x8x8xf32>
    %cst_81 = arith.constant dense<0xFF800000> : vector<2x8xf32>
    %199 = vector.multi_reduction <maximumf>, %198, %cst_81 [2] : vector<2x8x8xf32> to vector<2x8xf32>
    %200 = vector.shape_cast %199 : vector<2x8xf32> to vector<2x8x1xf32>
    %201 = vector.broadcast %200 : vector<2x8x1xf32> to vector<2x8x8xf32>
    %202 = arith.subf %198, %201 : vector<2x8x8xf32>
    %203 = math.exp %202 : vector<2x8x8xf32>
    %cst_82 = arith.constant dense<0.000000e+00> : vector<2x8xf32>
    %204 = vector.multi_reduction <add>, %203, %cst_82 [2] : vector<2x8x8xf32> to vector<2x8xf32>
    %205 = vector.shape_cast %204 : vector<2x8xf32> to vector<2x8x1xf32>
    %206 = tpu.reciprocal %205 {approx = true} : vector<2x8x1xf32> -> vector<2x8x1xf32>
    %207 = vector.broadcast %206 : vector<2x8x1xf32> to vector<2x8x8xf32>
    %208 = arith.mulf %203, %207 : vector<2x8x8xf32>
    %209 = arith.truncf %208 : vector<2x8x8xf32> to vector<2x8x8xbf16>
    %210 = vector.extract_strided_slice %193 {offsets = [0, 0, 0], sizes = [2, 8, 8], strides = [1, 1, 1]} : vector<2x8x32xbf16> to vector<2x8x8xbf16>
    "tpu.trace_start"() <{level = 10 : i32, message = "bqk,bkd->bqd"}> : () -> ()
    %cst_83 = arith.constant dense<0.000000e+00> : vector<2x8x8xf32>
    %211 = tpu.matmul %209, %210, %cst_83 {dimension_numbers = #tpu.dot_dimension_numbers<[2], [1], [1], [2], [0, 0, 0, 1, 1, 2], [0], [0]>} : vector<2x8x8xbf16>, vector<2x8x8xbf16>, vector<2x8x8xf32> -> vector<2x8x8xf32>
    "tpu.trace_stop"() : () -> ()
    %212 = vector.extract_strided_slice %189 {offsets = [0, 0, 8], sizes = [2, 8, 8], strides = [1, 1, 1]} : vector<2x8x32xbf16> to vector<2x8x8xbf16>
    %213 = vector.extract_strided_slice %191 {offsets = [0, 0, 8], sizes = [2, 8, 8], strides = [1, 1, 1]} : vector<2x8x32xbf16> to vector<2x8x8xbf16>
    "tpu.trace_start"() <{level = 10 : i32, message = "bqd,bkd->bqk"}> : () -> ()
    %cst_84 = arith.constant dense<0.000000e+00> : vector<2x8x8xf32>
    %214 = tpu.matmul %212, %213, %cst_84 {dimension_numbers = #tpu.dot_dimension_numbers<[2], [2], [1], [1], [0, 0, 0, 1, 1, 1], [0], [0]>} : vector<2x8x8xbf16>, vector<2x8x8xbf16>, vector<2x8x8xf32> -> vector<2x8x8xf32>
    "tpu.trace_stop"() : () -> ()
    %cst_85 = arith.constant 0.353553385 : f32
    %215 = vector.broadcast %cst_85 : f32 to vector<2x8x8xf32>
    %216 = arith.mulf %214, %215 : vector<2x8x8xf32>
    %cst_86 = arith.constant dense<0xFF800000> : vector<2x8xf32>
    %217 = vector.multi_reduction <maximumf>, %216, %cst_86 [2] : vector<2x8x8xf32> to vector<2x8xf32>
    %218 = vector.shape_cast %217 : vector<2x8xf32> to vector<2x8x1xf32>
    %219 = vector.broadcast %218 : vector<2x8x1xf32> to vector<2x8x8xf32>
    %220 = arith.subf %216, %219 : vector<2x8x8xf32>
    %221 = math.exp %220 : vector<2x8x8xf32>
    %cst_87 = arith.constant dense<0.000000e+00> : vector<2x8xf32>
    %222 = vector.multi_reduction <add>, %221, %cst_87 [2] : vector<2x8x8xf32> to vector<2x8xf32>
    %223 = vector.shape_cast %222 : vector<2x8xf32> to vector<2x8x1xf32>
    %224 = tpu.reciprocal %223 {approx = true} : vector<2x8x1xf32> -> vector<2x8x1xf32>
    %225 = vector.broadcast %224 : vector<2x8x1xf32> to vector<2x8x8xf32>
    %226 = arith.mulf %221, %225 : vector<2x8x8xf32>
    %227 = arith.truncf %226 : vector<2x8x8xf32> to vector<2x8x8xbf16>
    %228 = vector.extract_strided_slice %193 {offsets = [0, 0, 8], sizes = [2, 8, 8], strides = [1, 1, 1]} : vector<2x8x32xbf16> to vector<2x8x8xbf16>
    "tpu.trace_start"() <{level = 10 : i32, message = "bqk,bkd->bqd"}> : () -> ()
    %cst_88 = arith.constant dense<0.000000e+00> : vector<2x8x8xf32>
    %229 = tpu.matmul %227, %228, %cst_88 {dimension_numbers = #tpu.dot_dimension_numbers<[2], [1], [1], [2], [0, 0, 0, 1, 1, 2], [0], [0]>} : vector<2x8x8xbf16>, vector<2x8x8xbf16>, vector<2x8x8xf32> -> vector<2x8x8xf32>
    "tpu.trace_stop"() : () -> ()
    %230 = vector.extract_strided_slice %189 {offsets = [0, 0, 16], sizes = [2, 8, 8], strides = [1, 1, 1]} : vector<2x8x32xbf16> to vector<2x8x8xbf16>
    %231 = vector.extract_strided_slice %191 {offsets = [0, 0, 16], sizes = [2, 8, 8], strides = [1, 1, 1]} : vector<2x8x32xbf16> to vector<2x8x8xbf16>
    "tpu.trace_start"() <{level = 10 : i32, message = "bqd,bkd->bqk"}> : () -> ()
    %cst_89 = arith.constant dense<0.000000e+00> : vector<2x8x8xf32>
    %232 = tpu.matmul %230, %231, %cst_89 {dimension_numbers = #tpu.dot_dimension_numbers<[2], [2], [1], [1], [0, 0, 0, 1, 1, 1], [0], [0]>} : vector<2x8x8xbf16>, vector<2x8x8xbf16>, vector<2x8x8xf32> -> vector<2x8x8xf32>
    "tpu.trace_stop"() : () -> ()
    %cst_90 = arith.constant 0.353553385 : f32
    %233 = vector.broadcast %cst_90 : f32 to vector<2x8x8xf32>
    %234 = arith.mulf %232, %233 : vector<2x8x8xf32>
    %cst_91 = arith.constant dense<0xFF800000> : vector<2x8xf32>
    %235 = vector.multi_reduction <maximumf>, %234, %cst_91 [2] : vector<2x8x8xf32> to vector<2x8xf32>
    %236 = vector.shape_cast %235 : vector<2x8xf32> to vector<2x8x1xf32>
    %237 = vector.broadcast %236 : vector<2x8x1xf32> to vector<2x8x8xf32>
    %238 = arith.subf %234, %237 : vector<2x8x8xf32>
    %239 = math.exp %238 : vector<2x8x8xf32>
    %cst_92 = arith.constant dense<0.000000e+00> : vector<2x8xf32>
    %240 = vector.multi_reduction <add>, %239, %cst_92 [2] : vector<2x8x8xf32> to vector<2x8xf32>
    %241 = vector.shape_cast %240 : vector<2x8xf32> to vector<2x8x1xf32>
    %242 = tpu.reciprocal %241 {approx = true} : vector<2x8x1xf32> -> vector<2x8x1xf32>
    %243 = vector.broadcast %242 : vector<2x8x1xf32> to vector<2x8x8xf32>
    %244 = arith.mulf %239, %243 : vector<2x8x8xf32>
    %245 = arith.truncf %244 : vector<2x8x8xf32> to vector<2x8x8xbf16>
    %246 = vector.extract_strided_slice %193 {offsets = [0, 0, 16], sizes = [2, 8, 8], strides = [1, 1, 1]} : vector<2x8x32xbf16> to vector<2x8x8xbf16>
    "tpu.trace_start"() <{level = 10 : i32, message = "bqk,bkd->bqd"}> : () -> ()
    %cst_93 = arith.constant dense<0.000000e+00> : vector<2x8x8xf32>
    %247 = tpu.matmul %245, %246, %cst_93 {dimension_numbers = #tpu.dot_dimension_numbers<[2], [1], [1], [2], [0, 0, 0, 1, 1, 2], [0], [0]>} : vector<2x8x8xbf16>, vector<2x8x8xbf16>, vector<2x8x8xf32> -> vector<2x8x8xf32>
    "tpu.trace_stop"() : () -> ()
    %248 = vector.extract_strided_slice %189 {offsets = [0, 0, 24], sizes = [2, 8, 8], strides = [1, 1, 1]} : vector<2x8x32xbf16> to vector<2x8x8xbf16>
    %249 = vector.extract_strided_slice %191 {offsets = [0, 0, 24], sizes = [2, 8, 8], strides = [1, 1, 1]} : vector<2x8x32xbf16> to vector<2x8x8xbf16>
    "tpu.trace_start"() <{level = 10 : i32, message = "bqd,bkd->bqk"}> : () -> ()
    %cst_94 = arith.constant dense<0.000000e+00> : vector<2x8x8xf32>
    %250 = tpu.matmul %248, %249, %cst_94 {dimension_numbers = #tpu.dot_dimension_numbers<[2], [2], [1], [1], [0, 0, 0, 1, 1, 1], [0], [0]>} : vector<2x8x8xbf16>, vector<2x8x8xbf16>, vector<2x8x8xf32> -> vector<2x8x8xf32>
    "tpu.trace_stop"() : () -> ()
    %cst_95 = arith.constant 0.353553385 : f32
    %251 = vector.broadcast %cst_95 : f32 to vector<2x8x8xf32>
    %252 = arith.mulf %250, %251 : vector<2x8x8xf32>
    %cst_96 = arith.constant dense<0xFF800000> : vector<2x8xf32>
    %253 = vector.multi_reduction <maximumf>, %252, %cst_96 [2] : vector<2x8x8xf32> to vector<2x8xf32>
    %254 = vector.shape_cast %253 : vector<2x8xf32> to vector<2x8x1xf32>
    %255 = vector.broadcast %254 : vector<2x8x1xf32> to vector<2x8x8xf32>
    %256 = arith.subf %252, %255 : vector<2x8x8xf32>
    %257 = math.exp %256 : vector<2x8x8xf32>
    %cst_97 = arith.constant dense<0.000000e+00> : vector<2x8xf32>
    %258 = vector.multi_reduction <add>, %257, %cst_97 [2] : vector<2x8x8xf32> to vector<2x8xf32>
    %259 = vector.shape_cast %258 : vector<2x8xf32> to vector<2x8x1xf32>
    %260 = tpu.reciprocal %259 {approx = true} : vector<2x8x1xf32> -> vector<2x8x1xf32>
    %261 = vector.broadcast %260 : vector<2x8x1xf32> to vector<2x8x8xf32>
    %262 = arith.mulf %257, %261 : vector<2x8x8xf32>
    %263 = arith.truncf %262 : vector<2x8x8xf32> to vector<2x8x8xbf16>
    %264 = vector.extract_strided_slice %193 {offsets = [0, 0, 24], sizes = [2, 8, 8], strides = [1, 1, 1]} : vector<2x8x32xbf16> to vector<2x8x8xbf16>
    "tpu.trace_start"() <{level = 10 : i32, message = "bqk,bkd->bqd"}> : () -> ()
    %cst_98 = arith.constant dense<0.000000e+00> : vector<2x8x8xf32>
    %265 = tpu.matmul %263, %264, %cst_98 {dimension_numbers = #tpu.dot_dimension_numbers<[2], [1], [1], [2], [0, 0, 0, 1, 1, 2], [0], [0]>} : vector<2x8x8xbf16>, vector<2x8x8xbf16>, vector<2x8x8xf32> -> vector<2x8x8xf32>
    "tpu.trace_stop"() : () -> ()
    %266 = tpu.concatenate %211, %229, %247, %265 in 2 : vector<2x8x8xf32>, vector<2x8x8xf32>, vector<2x8x8xf32>, vector<2x8x8xf32> -> vector<2x8x32xf32>
    %267 = vector.shape_cast %266 : vector<2x8x32xf32> to vector<16x32xf32>
    %268 = arith.truncf %267 : vector<16x32xf32> to vector<16x32xbf16>
    %cst_99 = arith.constant dense<0.000000e+00> : vector<16x32xf32>
    %269 = tpu.matmul %268, %169, %cst_99 {dimension_numbers = #tpu.dot_dimension_numbers<[1], [0], [0], [1], [0, 0, 1, 1], [], []>} : vector<16x32xbf16>, vector<32x32xbf16>, vector<16x32xf32> -> vector<16x32xf32>
    %270 = vector.extract_strided_slice %173 {offsets = [0, 0], sizes = [1, 32], strides = [1, 1]} : vector<3x32xf32> to vector<1x32xf32>
    %271 = vector.broadcast %270 : vector<1x32xf32> to vector<16x32xf32>
    %272 = arith.addf %269, %271 : vector<16x32xf32>
    %273 = arith.addf %12, %272 : vector<16x32xf32>
    %cst_100 = arith.constant dense<0.000000e+00> : vector<16xf32>
    %274 = vector.multi_reduction <add>, %273, %cst_100 [1] : vector<16x32xf32> to vector<16xf32>
    %275 = vector.shape_cast %274 : vector<16xf32> to vector<16x1xf32>
    %cst_101 = arith.constant 3.200000e+01 : f32
    %276 = vector.broadcast %cst_101 : f32 to vector<16x1xf32>
    %277 = arith.divf %275, %276 : vector<16x1xf32>
    %278 = vector.broadcast %277 : vector<16x1xf32> to vector<16x32xf32>
    %279 = arith.subf %273, %278 : vector<16x32xf32>
    %280 = arith.mulf %279, %279 : vector<16x32xf32>
    %cst_102 = arith.constant dense<0.000000e+00> : vector<16xf32>
    %281 = vector.multi_reduction <add>, %280, %cst_102 [1] : vector<16x32xf32> to vector<16xf32>
    %282 = vector.shape_cast %281 : vector<16xf32> to vector<16x1xf32>
    %cst_103 = arith.constant 3.200000e+01 : f32
    %283 = vector.broadcast %cst_103 : f32 to vector<16x1xf32>
    %284 = arith.divf %282, %283 : vector<16x1xf32>
    %cst_104 = arith.constant 9.99999974E-6 : f32
    %285 = vector.broadcast %cst_104 : f32 to vector<16x1xf32>
    %286 = arith.addf %284, %285 : vector<16x1xf32>
    %287 = math.rsqrt %286 : vector<16x1xf32>
    %288 = vector.broadcast %287 : vector<16x1xf32> to vector<16x32xf32>
    %289 = arith.mulf %279, %288 : vector<16x32xf32>
    %290 = vector.extract_strided_slice %173 {offsets = [1, 0], sizes = [1, 32], strides = [1, 1]} : vector<3x32xf32> to vector<1x32xf32>
    %291 = vector.broadcast %290 : vector<1x32xf32> to vector<16x32xf32>
    %292 = arith.mulf %289, %291 : vector<16x32xf32>
    %293 = vector.extract_strided_slice %173 {offsets = [2, 0], sizes = [1, 32], strides = [1, 1]} : vector<3x32xf32> to vector<1x32xf32>
    %294 = vector.broadcast %293 : vector<1x32xf32> to vector<16x32xf32>
    %295 = arith.addf %292, %294 : vector<16x32xf32>
    %296 = vector.shape_cast %295 : vector<16x32xf32> to vector<2x8x32xf32>
    %297 = tpu.concatenate %157, %296 in 2 : vector<2x8x32xf32>, vector<2x8x32xf32> -> vector<2x8x64xf32>
    %c0_105 = arith.constant 0 : index
    %c0_106 = arith.constant 0 : index
    %c0_107 = arith.constant 0 : index
    %298 = vector.load %arg11[%c0_105, %c0_106, %c0_107] : memref<2x8x64xf32, #tpu.memory_space<vmem>>, vector<2x8x64xf32>
    tpu.vector_store %arg11[%c0_105, %c0_106, %c0_107], %297 {strides = array<i32>} : memref<2x8x64xf32, #tpu.memory_space<vmem>>, vector<2x8x64xf32>,
    return
  }
}

</mosaic_0001>

<bundles_post_ra>
// kernel: tpu_custom_call.1
= control target key start
LH: loop header
LB: loop body
LE: loop exit
PB: predicated region body
PF: predicated region fallthrough
CT: control target
= control target key end

     0   :  { %16 = vsyncpa [#allocation3], 0  ;;  %s4068_s0 = inlined_call_operand.hbm [shape: f32[2,8,32], index: 0, kind: input, shape index: {}]   ;;  %s4069_s1 = inlined_call_operand.hbm [shape: f32[2,8,48], index: 1, kind: input, shape index: {}]   ;;  %s4070_s2 = inlined_call_operand.hbm [shape: f32[32,32], index: 2, kind: input, shape index: {}]   ;;  %s4071_s3 = inlined_call_operand.vmem [shape: f32[48,32], index: 3, kind: input, shape index: {}]   ;;  %s4072_s4 = inlined_call_operand.hbm [shape: f32[2,32], index: 4, kind: input, shape index: {}]   ;;  %s4073_s5 = inlined_call_operand.vmem [shape: f32[2,32,32], index: 5, kind: input, shape index: {}]   ;;  %s4074_s6 = inlined_call_operand.vmem [shape: f32[2,32,32], index: 6, kind: input, shape index: {}]   ;;  %s4075_s7 = inlined_call_operand.hbm [shape: f32[2,32,32], index: 7, kind: input, shape index: {}]   ;;  %s4076_s8 = inlined_call_operand.hbm [shape: f32[2,32,32], index: 8, kind: input, shape index: {}]   ;;  %s4077_s9 = inlined_call_operand.vmem [shape: f32[2,3,32], index: 9, kind: input, shape index: {}]   ;;  %s4078_s10 = inlined_call_operand.vmem [shape: f32[2,3,32], index: 10, kind: input, shape index: {}]   ;;  %s4079_s11 = inlined_call_operand.hbm [shape: f32[2,8,64], index: 11, kind: output, shape index: {}]  }
   0x1   :  { %17 = vsyncpa [#allocation6], 0 }
   0x2   :  { %18 = vsyncpa [#allocation9], 0 }
   0x3   :  { %19 = vsyncpa [#allocation12], 0 }
   0x4   :  { %20 = vsyncpa [#allocation4], 0  ;;  %s3332_s17 = smov [#allocation5]   ;;  %s3333_s19 = smov [#allocation8]  }
   0x5   :  { %s38_s18 = sshll.u32 %s3332_s17, 4  ;;  %s65_s20 = sshll.u32 %s3333_s19, 4  ;;  %s39_s18 = int_to_ptr.vmem [resolvable:$true] %s38_s18  ;;  %s66_s20 = int_to_ptr.vmem [resolvable:$true] %s65_s20 }
   0x6   :  { %s3168_s23 = scalar_lea.hbm %s4069_s1, 256 }
   0x7   :  { %p3169_p0 = scmp.ne.s32.totalorder %s4069_s1, %s3168_s23  ;;  %p3172_p1 = scmp.lt.u32.totalorder %s3168_s23, %s4069_s1 }
   0x9   :  { %p3174_p2 = pnand %p3172_p1, %p3169_p0 }
   0xb   :  { %3177 = shalt.err (!%p3174_p2)
}
   0xc   :  { %s3178_s28 = scalar_lea.vmem %s39_s18, 256  ;;  %p3183_p4 = scmp.lt.s32.totalorder %s39_s18, %s39_s18 }
   0xd   :  { %p3179_p3 = scmp.ne.s32.totalorder %s39_s18, %s3178_s28  ;;  %p3184_p5 = scmp.lt.s32.totalorder %s3178_s28, %s3178_s28 }
   0xf   :  { %p3185_p6 = por %p3184_p5, %p3183_p4 }
  0x11   :  { %p3186_p7 = pnand %p3185_p6, %p3179_p3 }
  0x13   :  { %3189 = shalt.err (!%p3186_p7)
}
  0x14   :  { %s3334_s29 = smov 128   ;;  %s3335_s30 = smov 8  }
  0x15   :  { %44 = dma.hbm_to_vmem [thread:$0]  %s4069_s1, 256, %s39_s18, [#allocation6], %s3334_s29, %s3334_s29, %s3335_s30  }
  0x16   :  { %s3190_s16 = scalar_lea.hbm %s4072_s4, 32 }
  0x17   :  { %p3191_p8 = scmp.ne.s32.totalorder %s4072_s4, %s3190_s16  ;;  %p3194_p9 = scmp.lt.u32.totalorder %s3190_s16, %s4072_s4 }
  0x19   :  { %p3196_p10 = pnand %p3194_p9, %p3191_p8 }
  0x1b   :  { %3199 = shalt.err (!%p3196_p10)
}
  0x1c   :  { %s3200_s23 = scalar_lea.vmem %s66_s20, 32  ;;  %p3205_p12 = scmp.lt.s32.totalorder %s66_s20, %s66_s20 }
  0x1d   :  { %p3201_p11 = scmp.ne.s32.totalorder %s66_s20, %s3200_s23  ;;  %p3206_p13 = scmp.lt.s32.totalorder %s3200_s23, %s3200_s23 }
  0x1f   :  { %p3207_p0 = por %p3206_p13, %p3205_p12 }
  0x21   :  { %p3208_p1 = pnand %p3207_p0, %p3201_p11 }
  0x23   :  { %3211 = shalt.err (!%p3208_p1)
}
  0x24   :  { %68 = dma.hbm_to_vmem [thread:$0]  %s4072_s4, 32, %s66_s20, [#allocation9]  }
  0x25   :  { %s3336_s24 = smov [#allocation2]   ;;  %s3337_s26 = smov [#allocation7]  }
  0x26   :  { %s26_s25 = sshll.u32 %s3336_s24, 4  ;;  %s50_s27 = sshll.u32 %s3337_s26, 4  ;;  %s27_s25 = int_to_ptr.vmem [resolvable:$true] %s26_s25  ;;  %s3436_s27 = int_to_ptr.vmem [resolvable:$true] %s50_s27 }
  0x27   :  { %s3212_s13 = scalar_lea.hbm %s4068_s0, 256 }
  0x28   :  { %p3213_p2 = scmp.ne.s32.totalorder %s4068_s0, %s3212_s13  ;;  %p3216_p3 = scmp.lt.u32.totalorder %s3212_s13, %s4068_s0 }
  0x2a   :  { %p3218_p4 = pnand %p3216_p3, %p3213_p2 }
  0x2c   :  { %3221 = shalt.err (!%p3218_p4)
}
  0x2d   :  { %s3222_s4 = scalar_lea.vmem %s27_s25, 256  ;;  %p3227_p6 = scmp.lt.s32.totalorder %s27_s25, %s27_s25 }
  0x2e   :  { %p3223_p5 = scmp.ne.s32.totalorder %s27_s25, %s3222_s4  ;;  %p3228_p7 = scmp.lt.s32.totalorder %s3222_s4, %s3222_s4 }
  0x30   :  { %p3229_p8 = por %p3228_p7, %p3227_p6 }
  0x32   :  { %p3230_p9 = pnand %p3229_p8, %p3223_p5 }
  0x34   :  { %3233 = shalt.err (!%p3230_p9)
}
  0x35   :  { %32 = dma.hbm_to_vmem [thread:$0]  %s4068_s0, 256, %s27_s25, [#allocation3], %s3334_s29, %s3334_s29, %s3335_s30  }
  0x36   :  { %s3234_s23 = scalar_lea.hbm %s4070_s2, 512 }
  0x37   :  { %p3235_p10 = scmp.ne.s32.totalorder %s4070_s2, %s3234_s23  ;;  %p3238_p11 = scmp.lt.u32.totalorder %s3234_s23, %s4070_s2 }
  0x39   :  { %p3240_p12 = pnand %p3238_p11, %p3235_p10 }
  0x3b   :  { %3243 = shalt.err (!%p3240_p12)
}
  0x3c   :  { %s3244_s28 = scalar_lea.vmem %s3436_s27, 512  ;;  %p3249_p0 = scmp.lt.s32.totalorder %s3436_s27, %s3436_s27 }
  0x3d   :  { %p3245_p13 = scmp.ne.s32.totalorder %s3436_s27, %s3244_s28  ;;  %p3250_p1 = scmp.lt.s32.totalorder %s3244_s28, %s3244_s28 }
  0x3f   :  { %p3251_p2 = por %p3250_p1, %p3249_p0 }
  0x41   :  { %p3252_p3 = pnand %p3251_p2, %p3245_p13 }
  0x43   :  { %3255 = shalt.err (!%p3252_p3)
}
  0x44   :  { %56 = dma.hbm_to_vmem [thread:$0]  %s4070_s2, 512, %s3436_s27, [#allocation6], %s3334_s29, %s3334_s29, %s3335_s30  }
  0x45   :  { %s3338_s12 = smov [#allocation10]   ;;  %s3339_s14 = smov [#allocation11]  }
  0x46   :  { %s78_s13 = sshll.u32 %s3338_s12, 4  ;;  %s90_s15 = sshll.u32 %s3339_s14, 4  ;;  %s79_s13 = int_to_ptr.vmem [resolvable:$true] %s78_s13  ;;  %s3473_s15 = int_to_ptr.vmem [resolvable:$true] %s90_s15 }
  0x47   :  { %s3256_s4 = scalar_lea.hbm %s4075_s7, 1024 }
  0x48   :  { %p3257_p4 = scmp.ne.s32.totalorder %s4075_s7, %s3256_s4  ;;  %p3260_p5 = scmp.lt.u32.totalorder %s3256_s4, %s4075_s7 }
  0x4a   :  { %p3262_p6 = pnand %p3260_p5, %p3257_p4 }
  0x4c   :  { %3265 = shalt.err (!%p3262_p6)
}
  0x4d   :  { %s3266_s2 = scalar_lea.vmem %s79_s13, 1024  ;;  %p3271_p8 = scmp.lt.s32.totalorder %s79_s13, %s79_s13 }
  0x4e   :  { %p3267_p7 = scmp.ne.s32.totalorder %s79_s13, %s3266_s2  ;;  %p3272_p9 = scmp.lt.s32.totalorder %s3266_s2, %s3266_s2 }
  0x50   :  { %p3273_p10 = por %p3272_p9, %p3271_p8 }
  0x52   :  { %p3274_p11 = pnand %p3273_p10, %p3267_p7 }
  0x54   :  { %3277 = shalt.err (!%p3274_p11)
}
  0x55   :  { %84 = dma.hbm_to_vmem [thread:$0]  %s4075_s7, 1024, %s79_s13, [#allocation9], %s3334_s29, %s3334_s29, %s3335_s30  }
  0x56   :  { %s3278_s24 = scalar_lea.hbm %s4076_s8, 1024 }
  0x57   :  { %p3279_p12 = scmp.ne.s32.totalorder %s4076_s8, %s3278_s24  ;;  %p3282_p13 = scmp.lt.u32.totalorder %s3278_s24, %s4076_s8 }
  0x59   :  { %p3284_p0 = pnand %p3282_p13, %p3279_p12 }
  0x5b   :  { %3287 = shalt.err (!%p3284_p0)
}
  0x5c   :  { %s3288_s12 = scalar_lea.vmem %s3473_s15, 1024  ;;  %p3293_p2 = scmp.lt.s32.totalorder %s3473_s15, %s3473_s15 }
  0x5d   :  { %p3289_p1 = scmp.ne.s32.totalorder %s3473_s15, %s3288_s12  ;;  %p3294_p3 = scmp.lt.s32.totalorder %s3288_s12, %s3288_s12 }
  0x5f   :  { %p3295_p4 = por %p3294_p3, %p3293_p2 }
  0x61   :  { %p3296_p5 = pnand %p3295_p4, %p3289_p1 }
  0x63   :  { %3299 = shalt.err (!%p3296_p5)
}
  0x64   :  { %96 = dma.hbm_to_vmem [thread:$0]  %s4076_s8, 1024, %s3473_s15, [#allocation12], %s3334_s29, %s3334_s29, %s3335_s30  }
  0x65   :  { %3322 = dma.done.wait [#allocation3], 256  }
  0x66   :  { %3323 = vsyncadd [#allocation3], 4294967040 }
  0x67   :  { %3324 = dma.done.wait [#allocation6], 768  }
  0x68   :  { %3325 = vsyncadd [#allocation6], 4294966528 }
  0x69   :  { %3326 = dma.done.wait [#allocation9], 1056  }
  0x6a   :  { %3327 = vsyncadd [#allocation9], 4294966240 }
  0x6b   :  { %3328 = dma.done.wait [#allocation12], 1024  }
  0x6c   :  { %3329 = vsyncadd [#allocation12], 4294966272  ;;  %v3340_v0 = vmov 0.0   ;;  %vm3341_vm0 = vmmov 0   ;;  %v127_v1 = vld [vmem:[#allocation7] sm:$0xff]  ;;  %v128_v2 = vld [vmem:[#allocation7 + $0x8] sm:$0xff]  ;;  %v133_v34 = vlaneseq }
  0x6d   :  { %2775 = vmatprep.subr.bf16.mxu0 %v3340_v0  ;;  %2783 = vmatprep.subr.bf16.mxu1 %v3340_v0  ;;  %v182_v3 = vld [vmem:[%s4071_s3] sm:$0xff]  ;;  %v131_v4 = vpack.c.bf16 %v128_v2, %v127_v1  ;;  %v183_v5 = vld [vmem:[%s4071_s3 + $0x8] sm:$0xff]  ;;  %v129_v6 = vld [vmem:[#allocation7 + $0x10] sm:$0xff]  ;;  %vm137_vm1 = vcmask 261120   ;;  %vm195_vm2 = vcmask 392192   ;;  %vm415_vm3 = vcmask 64512  }
  0x6e   :  { %2779 = vmatprep.mubr.msk.bf16.mxu0 %vm3341_vm0, %v3340_v0  ;;  %2789 = vmatprep.mubr.msk.bf16.mxu1 %vm3341_vm0, %v3340_v0  ;;  %v130_v7 = vld [vmem:[#allocation7 + $0x18] sm:$0xff]  ;;  %v188_v8 = vpack.c.bf16 %v183_v5, %v182_v3  ;;  %v184_v9 = vld [vmem:[%s4071_s3 + $0x10] sm:$0xff]  ;;  %v120_v12 = vld [vmem:[#allocation2] sm:$0xff]  ;;  %v134_v35 = vshrl.u32 %v133_v34, 7  ;;  %s3342_s20 = smov 120   ;;  %vm537_vm4 = vcmask 1043456  }
  0x6f   :  { %v185_v10 = vld [vmem:[%s4071_s3 + $0x18] sm:$0xff]  ;;  %2776 = vmatpush3.bf16.msra.mxu0 %v131_v4  ;;  %v132_v11 = vpack.c.bf16 %v130_v7, %v129_v6  ;;  %v121_v13 = vld [vmem:[#allocation2 + $0x8] sm:$0xff]  ;;  %v186_v15 = vld [vmem:[%s4071_s3 + $0x20] sm:$0xff]  ;;  %s3343_s19 = smov 112   ;;  %s3344_s21 = smov 104   ;;  %vm1325_vm5 = vcmask 130048  }
  0x70   :  { %2784 = vmatpush3.bf16.msra.mxu1 %v188_v8  ;;  %2777 = vmatprep.subr.bf16.mxu0 %v3340_v0  ;;  %v189_v14 = vpack.c.bf16 %v185_v10, %v184_v9  ;;  %v187_v16 = vld [vmem:[%s4071_s3 + $0x28] sm:$0xff]  ;;  %v122_v17 = vpack.c.bf16 %v121_v13, %v120_v12  ;;  %v123_v19 = vld [vmem:[#allocation5] sm:$0xff]  ;;  %v124_v20 = vld [vmem:[#allocation5 + $0x8] sm:$0xff]  ;;  %v3572_v36 = vsub.s32 0, %v134_v35  ;;  %v3574_v38 = vsub.s32 1, %v134_v35  ;;  %s3345_s22 = smov 16  }
  0x71   :  { %2785 = vmatprep.subr.bf16.mxu1 %v3340_v0  ;;  %v190_v18 = vpack.c.bf16 %v187_v16, %v186_v15  ;;  %v125_v21 = vpack.c.bf16 %v124_v20, %v123_v19  ;;  %v246_v22 = vld [vmem:[%s4074_s6] sm:$0xff]  ;;  %v247_v23 = vld [vmem:[%s4074_s6 + $0x8] sm:$0xff]  ;;  %v248_v27 = vld [vmem:[%s4074_s6 + $0x10] sm:$0xff]  ;;  %v3619_v12 = vsub.s32 2, %v134_v35  ;;  %vm1328_vm6 = vcmask 195584  }
  0x72   :  { %v250_v24 = vpack.c.bf16 %v247_v23, %v246_v22  ;;  %v240_v25 = vld [vmem:[%s4073_s5] sm:$0xff]  ;;  %v241_v26 = vld [vmem:[%s4073_s5 + $0x8] sm:$0xff]  ;;  %v249_v29 = vld [vmem:[%s4074_s6 + $0x18] sm:$0xff]  ;;  %vm2605_vm7 = vcmask 523264  }
  0x73   :  { %2778 = vmatpush3.bf16.msra.mxu0 %v132_v11  ;;  %v244_v28 = vpack.c.bf16 %v241_v26, %v240_v25  ;;  %v251_v30 = vpack.c.bf16 %v249_v29, %v248_v27  ;;  %v242_v31 = vld [vmem:[%s4073_s5 + $0x10] sm:$0xff]  ;;  %v243_v32 = vld [vmem:[%s4073_s5 + $0x18] sm:$0xff]  ;;  %v126_v37 = vld [vmem:[#allocation8] sm:$0x3] }
  0x74   :  { %2786 = vmatpush3.bf16.msra.mxu1 %v189_v14  ;;  %2793 = vmatprep.subr.bf16.mxu0 %v3340_v0  ;;  %v245_v33 = vpack.c.bf16 %v243_v32, %v242_v31  ;;  %v136_v39 = vrot.slane %v126_v37, %v3572_v36  ;;  %v194_v43 = vrot.slane %v126_v37, %v3574_v38  ;;  %v252_v51 = vld [vmem:[#allocation10] sm:$0xff]  ;;  %v253_v52 = vld [vmem:[#allocation10 + $0x8] sm:$0xff]  ;;  %v254_v58 = vld [vmem:[#allocation10 + $0x10] sm:$0xff] }
  0x75   :  { %2787 = vmatprep.subr.bf16.mxu1 %v3340_v0  ;;  %v256_v56 = vpack.c.bf16 %v253_v52, %v252_v51  ;;  %v255_v59 = vld [vmem:[#allocation10 + $0x18] sm:$0xff] }
  0x76   :  { %2780 = vmatmul.mubr.msk.bf16.vlgmr.msra.gmra.mrb[0].mxu0 %vm137_vm1, %v122_v17  ;;  %v257_v60 = vpack.c.bf16 %v255_v59, %v254_v58  ;;  %v264_v61 = vld [vmem:[%s4077_s9] sm:$0x7] }
  0x77   :  { %2797 = vmatprep.mubr.msk.bf16.mxu0 %vm3341_vm0, %v3340_v0  ;;  %2794 = vmatpush3.bf16.msra.mxu0 %v244_v28  ;;  %v319_v62 = vrot.slane %v264_v61, %v3574_v38  ;;  %v271_v7 = vrot.slane %v264_v61, %v3572_v36 }
  0x78   :  { %2788 = vmatpush3.bf16.msra.mxu1 %v190_v18  ;;  %2795 = vmatprep.subr.bf16.mxu0 %v3340_v0  ;;  %v367_v18 = vrot.slane %v264_v61, %v3619_v12 }
  0x79   :  { %2801 = vmatprep.subr.bf16.mxu1 %v3340_v0 }
  0x7b   :  { %2790 = vmatmul.mubr.msk.bf16.vlgmr.msra.gmra.mrb[0].mxu1 %vm195_vm2, %v125_v21  ;;  %2796 = vmatpush3.bf16.msra.mxu0 %v245_v33 }
  0x7c   :  { %2805 = vmatprep.mubr.msk.bf16.mxu1 %vm3341_vm0, %v3340_v0  ;;  %2802 = vmatpush3.bf16.msra.mxu1 %v250_v24 }
  0x7d   :  { %2803 = vmatprep.subr.bf16.mxu1 %v3340_v0  ;;  %2809 = vmatprep.subr.bf16.mxu0 %v3340_v0 }
  0x80   :  { %2804 = vmatpush3.bf16.msra.mxu1 %v251_v30 }
  0x81   :  { %2817 = vmatprep.subr.bf16.mxu1 %v3340_v0 }
 0x149   :  { %v175_v40 = vpop.f32.mrb[0].mxu0 }
 0x14a   :  { %v2781_v41 = vpop.f32.mrb[1].mxu0  ;;  %v3578_v44 = vadd.f32 %v175_v40, %v136_v39 }
 0x14b   :  { %v178_v42 = vpop.f32.mrb[2].mxu0 }
 0x14c   :  { %v3580_v45 = vadd.f32 %v178_v42, %v136_v39  ;;  %v2782_v46 = vpop.f32.mrb[3].mxu0 }
 0x14e   :  { %v3584_v47 = vpack.c.bf16 %v3580_v45, %v3578_v44  ;;  %v233_v48 = vpop.f32.mrb[0].mxu1 }
 0x14f   :  { %v3586_v49 = vadd.f32 %v233_v48, %v194_v43  ;;  %v2791_v50 = vpop.f32.mrb[1].mxu1 }
 0x150   :  { %v236_v53 = vpop.f32.mrb[2].mxu1  ;;  %2806 = vmatmul.mubr.msk.bf16.vlgmr.msra.gmra.mrb[4].mxu1 %vm137_vm1, %v3584_v47 }
 0x151   :  { %v3590_v54 = vadd.f32 %v236_v53, %v194_v43  ;;  %v2792_v55 = vpop.f32.mrb[3].mxu1  ;;  %2819 = vmatprep.mubr.msk.bf16.mxu1 %vm3341_vm0, %v3340_v0 }
 0x153   :  { %v3596_v57 = vpack.c.bf16 %v3590_v54, %v3586_v49 }
 0x155   :  { %2798 = vmatmul.mubr.msk.bf16.vlgmr.msra.gmra.mrb[4].mxu0 %vm137_vm1, %v3596_v57 }
 0x156   :  { %2810 = vmatpush3.bf16.msra.mxu0 %v256_v56  ;;  %2813 = vmatprep.mubr.msk.bf16.mxu0 %vm3341_vm0, %v3340_v0 }
 0x157   :  { %2811 = vmatprep.subr.bf16.mxu0 %v3340_v0 }
 0x15a   :  { %2812 = vmatpush3.bf16.msra.mxu0 %v257_v60 }
 0x15b   :  { %2823 = vmatprep.subr.bf16.mxu0 %v3340_v0 }
 0x15d   :  { %2814 = vmatmul.mubr.msk.bf16.vlgmr.msra.gmra.mrb[8].mxu0 %vm137_vm1, %v3584_v47 }
 0x15e   :  { %2825 = vmatprep.mubr.msk.bf16.mxu0 %vm3341_vm0, %v3340_v0 }
 0x223   :  { %v357_v63 = vpop.f32.mrb[4].mxu1 }
 0x224   :  { %v358_v1 = vadd.f32 %v357_v63, %v319_v62  ;;  %v2807_v2 = vpop.f32.mrb[5].mxu1 }
 0x225   :  { %v360_v3 = vpop.f32.mrb[6].mxu1 }
 0x226   :  { %v3612_v4 = vpack.c.bf16 %v358_v1, %v358_v1  ;;  %v361_v5 = vadd.f32 %v360_v3, %v319_v62  ;;  %v2808_v6 = vpop.f32.mrb[7].mxu1 }
 0x228   :  { %v3615_v8 = vpack.c.bf16 %v361_v5, %v361_v5  ;;  %v309_v9 = vpop.f32.mrb[4].mxu0  ;;  %v420_v10 = vsel %vm415_vm3, %v3612_v4, 0 }
 0x229   :  { %v2799_v11 = vpop.f32.mrb[5].mxu0  ;;  %2818 = vmatpush3.bf16.xpose.msra.mxu1 %v420_v10  ;;  %v310_v13 = vadd.f32 %v309_v9, %v271_v7 }
 0x22a   :  { %v312_v14 = vpop.f32.mrb[6].mxu0  ;;  %683 = vrot.lane.b32.xlu1 %v3615_v8, %s3342_s20  ;;  %v466_v15 = vsel %vm415_vm3, %v3615_v8, 0  ;;  %2829 = vmatprep.subr.bf16.mxu1 %v3340_v0 }
 0x22b   :  { %v2800_v16 = vpop.f32.mrb[7].mxu0  ;;  %2824 = vmatpush3.bf16.xpose.msra.mxu0 %v466_v15  ;;  %v313_v17 = vadd.f32 %v312_v14, %v271_v7  ;;  %v3628_v19 = vpack.c.bf16 %v310_v13, %v310_v13 }
 0x22c   :  { %2835 = vmatprep.subr.bf16.mxu0 %v3340_v0 }
 0x22d   :  { %v3630_v20 = vpack.c.bf16 %v313_v17, %v313_v17 }
 0x230   :  { %v402_v21 = vpop.f32.mrb[8].mxu0  ;;  %2820 = vmatmul.mubr.msk.bf16.vlgmr.msra.gmra.mrb[8].mxu1 %vm415_vm3, %v3628_v19 }
 0x231   :  { %v403_v22 = vadd.f32 %v402_v21, %v367_v18  ;;  %v2815_v23 = vpop.f32.mrb[9].mxu0  ;;  %2831 = vmatprep.mubr.msk.bf16.mxu1 %vm3341_vm0, %v3340_v0 }
 0x232   :  { %v405_v24 = vpop.f32.mrb[10].mxu0  ;;  %2826 = vmatmul.mubr.msk.bf16.vlgmr.msra.gmra.mrb[12].mxu0 %vm415_vm3, %v3630_v20 }
 0x233   :  { %v3638_v25 = vpack.c.bf16 %v403_v22, %v403_v22  ;;  %v406_v26 = vadd.f32 %v405_v24, %v367_v18  ;;  %v2816_v27 = vpop.f32.mrb[11].mxu0  ;;  %2837 = vmatprep.mubr.msk.bf16.mxu0 %vm3341_vm0, %v3340_v0 }
 0x235   :  { %v3642_v28 = vpack.c.bf16 %v406_v26, %v406_v26  ;;  %v539_v29 = vsel %vm537_vm4, %v3638_v25, 0 }
 0x236   :  { %2830 = vmatpush3.bf16.msra.mxu1 %v539_v29 }
 0x237   :  { %v585_v30 = vsel %vm537_vm4, %v3642_v28, 0  ;;  %2841 = vmatprep.subr.bf16.mxu1 %v3340_v0 }
 0x238   :  { %2836 = vmatpush3.bf16.msra.mxu0 %v585_v30 }
 0x239   :  { %2847 = vmatprep.subr.bf16.mxu0 %v3340_v0 }
 0x29c   :  { %v684_v61 = vpop.permute.xlu1 %683 }
 0x29d   :  { %v689_v11 = vsel %vm415_vm3, %v684_v61, 0 }
 0x303   :  { %v456_v31 = vpop.f32.mrb[8].mxu1 }
 0x304   :  { %v508_v32 = vmul.f32 0.35355338, %v456_v31  ;;  %v2821_v33 = vpop.f32.mrb[9].mxu1 }
 0x305   :  { %v459_v34 = vpop.f32.mrb[10].mxu1  ;;  %v502_v35 = vpop.f32.mrb[12].mxu0 }
 0x306   :  { %v509_v37 = vmul.f32 0.35355338, %v502_v35  ;;  %v2822_v39 = vpop.f32.mrb[11].mxu1  ;;  %v2827_v40 = vpop.f32.mrb[13].mxu0  ;;  %v510_v41 = vsel %vm415_vm3, %v508_v32, -inf }
 0x307   :  { %511 = vmax.xlane.f32.xlu0 %v510_v41  ;;  %v505_v42 = vpop.f32.mrb[14].mxu0 }
 0x308   :  { %v2828_v43 = vpop.f32.mrb[15].mxu0  ;;  %v513_v46 = vsel %vm415_vm3, %v509_v37, -inf }
 0x30b   :  { %514 = vmax.xlane.f32.xlu0 %v513_v46 }
 0x321   :  { %631 = vrot.lane.b32.xlu0 %v3612_v4, %s3342_s20 }
 0x394   :  { %v512_v48 = vpop.xlane.xlu0 %511 }
 0x395   :  { %v516_v50 = vsub.f32 %v508_v32, %v512_v48 }
 0x397   :  { %v518_v51 = vmul.f32 1.442695, %v516_v50 }
 0x398   :  { %v515_v52 = vpop.xlane.xlu0 %514 }
 0x399   :  { %3096 = vpow2.f32 %v518_v51  ;;  %v517_v53 = vsub.f32 %v509_v37, %v515_v52 }
 0x39b   :  { %v520_v55 = vmul.f32 1.442695, %v517_v53 }
 0x39c   :  { %v632_v3 = vpop.permute.xlu0 %631 }
 0x39d   :  { %3098 = vpow2.f32 %v520_v55  ;;  %v637_v7 = vsel %vm415_vm3, %v632_v3, 0 }
 0x3a3   :  { %v3097_v56 = vpop.eup %3096 }
 0x3a4   :  { %v522_v58 = vsel %vm415_vm3, %v3097_v56, 0.0 }
 0x3a5   :  { %523 = vadd.xlane.f32.xlu1 %v522_v58 }
 0x3a7   :  { %v3099_v59 = vpop.eup %3098 }
 0x3a8   :  { %v525_v60 = vsel %vm415_vm3, %v3099_v59, 0.0 }
 0x3a9   :  { %526 = vadd.xlane.f32.xlu1 %v525_v60 }
 0x3ba   :  { %628 = vrot.lane.b32.xlu1 %v3628_v19, %s3342_s20 }
 0x3be   :  { %680 = vrot.lane.b32.xlu1 %v3630_v20, %s3342_s20 }
 0x432   :  { %v524_v62 = vpop.xlane.xlu1 %523 }
 0x433   :  { %3100 = vrcp.f32 %v524_v62 }
 0x436   :  { %v527_v63 = vpop.xlane.xlu1 %526 }
 0x437   :  { %3102 = vrcp.f32 %v527_v63 }
 0x43a   :  { %v629_v13 = vpop.permute.xlu1 %628 }
 0x43d   :  { %v3101_v1 = vpop.eup %3100 }
 0x43e   :  { %v530_v2 = vmul.f32 %v3101_v1, %v3097_v56  ;;  %v681_v14 = vpop.permute.xlu1 %680 }
 0x440   :  { %v532_v5 = vpack.c.bf16 %v530_v2, %v530_v2 }
 0x441   :  { %v3103_v6 = vpop.eup %3102 }
 0x442   :  { %v531_v9 = vmul.f32 %v3103_v6, %v3099_v59  ;;  %2832 = vmatmul.mubr.msk.bf16.vlgmr.msra.gmra.mrb[12].mxu1 %vm415_vm3, %v532_v5 }
 0x443   :  { %2842 = vmatpush3.bf16.xpose.msra.mxu1 %v637_v7  ;;  %2843 = vmatprep.mubr.msk.bf16.mxu1 %vm3341_vm0, %v3340_v0 }
 0x444   :  { %v533_v10 = vpack.c.bf16 %v531_v9, %v531_v9  ;;  %2853 = vmatprep.subr.bf16.mxu1 %v3340_v0 }
 0x446   :  { %2838 = vmatmul.mubr.msk.bf16.vlgmr.msra.gmra.mrb[16].mxu0 %vm415_vm3, %v533_v10 }
 0x447   :  { %2848 = vmatpush3.bf16.xpose.msra.mxu0 %v689_v11  ;;  %2849 = vmatprep.mubr.msk.bf16.mxu0 %vm3341_vm0, %v3340_v0 }
 0x448   :  { %2859 = vmatprep.subr.bf16.mxu0 %v3340_v0 }
 0x44a   :  { %2844 = vmatmul.mubr.msk.bf16.vlgmr.msra.gmra.mrb[16].mxu1 %vm415_vm3, %v629_v13 }
 0x44b   :  { %2855 = vmatprep.mubr.msk.bf16.mxu1 %vm3341_vm0, %v3340_v0 }
 0x44e   :  { %2850 = vmatmul.mubr.msk.bf16.vlgmr.msra.gmra.mrb[20].mxu0 %vm415_vm3, %v681_v14 }
 0x44f   :  { %2861 = vmatprep.mubr.msk.bf16.mxu0 %vm3341_vm0, %v3340_v0 }
 0x515   :  { %v3676_v15 = vpop.f32.mrb[12].mxu1 }
 0x516   :  { %v2833_v16 = vpop.f32.mrb[13].mxu1 }
 0x517   :  { %v578_v17 = vpop.f32.mrb[14].mxu1 }
 0x518   :  { %v2834_v18 = vpop.f32.mrb[15].mxu1 }
 0x519   :  { %v3678_v21 = vpop.f32.mrb[16].mxu0 }
 0x51a   :  { %v2839_v22 = vpop.f32.mrb[17].mxu0 }
 0x51b   :  { %v624_v23 = vpop.f32.mrb[18].mxu0 }
 0x51c   :  { %v2840_v24 = vpop.f32.mrb[19].mxu0 }
 0x51d   :  { %v673_v26 = vpop.f32.mrb[16].mxu1 }
 0x51e   :  { %v731_v27 = vmul.f32 0.35355338, %v673_v26  ;;  %v2845_v29 = vpop.f32.mrb[17].mxu1 }
 0x51f   :  { %v676_v30 = vpop.f32.mrb[18].mxu1 }
 0x520   :  { %v2846_v31 = vpop.f32.mrb[19].mxu1  ;;  %v733_v32 = vsel %vm415_vm3, %v731_v27, -inf }
 0x521   :  { %734 = vmax.xlane.f32.xlu0 %v733_v32  ;;  %v725_v33 = vpop.f32.mrb[20].mxu0 }
 0x522   :  { %v732_v34 = vmul.f32 0.35355338, %v725_v33  ;;  %v2851_v35 = vpop.f32.mrb[21].mxu0 }
 0x523   :  { %v728_v37 = vpop.f32.mrb[22].mxu0 }
 0x524   :  { %v2852_v39 = vpop.f32.mrb[23].mxu0  ;;  %v736_v40 = vsel %vm415_vm3, %v732_v34, -inf }
 0x525   :  { %737 = vmax.xlane.f32.xlu1 %v736_v40 }
 0x536   :  { %807 = vrot.lane.b32.xlu1 %v3642_v28, %s3342_s20 }
 0x53a   :  { %857 = vrot.lane.b32.xlu1 %v3612_v4, %s3343_s19 }
 0x53e   :  { %907 = vrot.lane.b32.xlu1 %v3615_v8, %s3343_s19 }
 0x542   :  { %905 = vrot.lane.b32.xlu1 %v3630_v20, %s3343_s19 }
 0x5ae   :  { %v735_v41 = vpop.xlane.xlu0 %734 }
 0x5af   :  { %v739_v42 = vsub.f32 %v731_v27, %v735_v41 }
 0x5b1   :  { %v741_v43 = vmul.f32 1.442695, %v739_v42 }
 0x5b2   :  { %v738_v46 = vpop.xlane.xlu1 %737 }
 0x5b3   :  { %3104 = vpow2.f32 %v741_v43  ;;  %v740_v48 = vsub.f32 %v732_v34, %v738_v46 }
 0x5b5   :  { %v743_v50 = vmul.f32 1.442695, %v740_v48 }
 0x5b6   :  { %v808_v51 = vpop.permute.xlu1 %807 }
 0x5b7   :  { %3106 = vpow2.f32 %v743_v50  ;;  %v813_v52 = vsel %vm537_vm4, %v808_v51, 0 }
 0x5b8   :  { %2860 = vmatpush3.bf16.msra.mxu0 %v813_v52 }
 0x5b9   :  { %2871 = vmatprep.subr.bf16.mxu0 %v3340_v0 }
 0x5ba   :  { %v858_v1 = vpop.permute.xlu1 %857 }
 0x5bb   :  { %v863_v9 = vsel %vm415_vm3, %v858_v1, 0 }
 0x5bd   :  { %v3105_v53 = vpop.eup %3104 }
 0x5be   :  { %v745_v55 = vsel %vm415_vm3, %v3105_v53, 0.0  ;;  %v908_v7 = vpop.permute.xlu1 %907 }
 0x5bf   :  { %746 = vadd.xlane.f32.xlu0 %v745_v55  ;;  %v913_v11 = vsel %vm415_vm3, %v908_v7, 0 }
 0x5c1   :  { %v3107_v56 = vpop.eup %3106 }
 0x5c2   :  { %v748_v58 = vsel %vm415_vm3, %v3107_v56, 0.0  ;;  %v906_v14 = vpop.permute.xlu1 %905 }
 0x5c3   :  { %749 = vadd.xlane.f32.xlu0 %v748_v58 }
 0x5d9   :  { %758 = vrot.lane.b32.xlu0 %v3638_v25, %s3342_s20 }
 0x5dd   :  { %855 = vrot.lane.b32.xlu0 %v3628_v19, %s3343_s19 }
 0x64c   :  { %v747_v59 = vpop.xlane.xlu0 %746 }
 0x64d   :  { %3108 = vrcp.f32 %v747_v59 }
 0x650   :  { %v750_v60 = vpop.xlane.xlu0 %749 }
 0x651   :  { %3110 = vrcp.f32 %v750_v60 }
 0x654   :  { %v759_v61 = vpop.permute.xlu0 %758 }
 0x655   :  { %v764_v62 = vsel %vm537_vm4, %v759_v61, 0 }
 0x656   :  { %2854 = vmatpush3.bf16.msra.mxu1 %v764_v62 }
 0x657   :  { %v3109_v63 = vpop.eup %3108  ;;  %2865 = vmatprep.subr.bf16.mxu1 %v3340_v0 }
 0x658   :  { %v753_v2 = vmul.f32 %v3109_v63, %v3105_v53  ;;  %v856_v13 = vpop.permute.xlu0 %855 }
 0x65a   :  { %v755_v3 = vpack.c.bf16 %v753_v2, %v753_v2 }
 0x65b   :  { %v3111_v5 = vpop.eup %3110 }
 0x65c   :  { %v754_v6 = vmul.f32 %v3111_v5, %v3107_v56  ;;  %2856 = vmatmul.mubr.msk.bf16.vlgmr.msra.gmra.mrb[20].mxu1 %vm415_vm3, %v755_v3 }
 0x65d   :  { %2867 = vmatprep.mubr.msk.bf16.mxu1 %vm3341_vm0, %v3340_v0 }
 0x65e   :  { %v756_v10 = vpack.c.bf16 %v754_v6, %v754_v6 }
 0x65f   :  { %2866 = vmatpush3.bf16.xpose.msra.mxu1 %v863_v9 }
 0x660   :  { %2862 = vmatmul.mubr.msk.bf16.vlgmr.msra.gmra.mrb[24].mxu0 %vm415_vm3, %v756_v10  ;;  %2877 = vmatprep.subr.bf16.mxu1 %v3340_v0 }
 0x661   :  { %2872 = vmatpush3.bf16.xpose.msra.mxu0 %v913_v11  ;;  %2873 = vmatprep.mubr.msk.bf16.mxu0 %vm3341_vm0, %v3340_v0 }
 0x662   :  { %2883 = vmatprep.subr.bf16.mxu0 %v3340_v0 }
 0x666   :  { %2868 = vmatmul.mubr.msk.bf16.vlgmr.msra.gmra.mrb[24].mxu1 %vm415_vm3, %v856_v13 }
 0x667   :  { %2879 = vmatprep.mubr.msk.bf16.mxu1 %vm3341_vm0, %v3340_v0 }
 0x668   :  { %2874 = vmatmul.mubr.msk.bf16.vlgmr.msra.gmra.mrb[28].mxu0 %vm415_vm3, %v906_v14 }
 0x669   :  { %2885 = vmatprep.mubr.msk.bf16.mxu0 %vm3341_vm0, %v3340_v0 }
 0x72f   :  { %v3716_v16 = vpop.f32.mrb[20].mxu1 }
 0x730   :  { %v2857_v17 = vpop.f32.mrb[21].mxu1 }
 0x731   :  { %v803_v18 = vpop.f32.mrb[22].mxu1 }
 0x732   :  { %v2858_v22 = vpop.f32.mrb[23].mxu1 }
 0x733   :  { %v3718_v23 = vpop.f32.mrb[24].mxu0 }
 0x734   :  { %v3066_v24 = vpack.i.bf16 %v3718_v23, %v3716_v16  ;;  %v2863_v26 = vpop.f32.mrb[25].mxu0 }
 0x735   :  { %v852_v27 = vpop.f32.mrb[26].mxu0 }
 0x736   :  { %v2864_v29 = vpop.f32.mrb[27].mxu0 }
 0x739   :  { %v899_v30 = vpop.f32.mrb[24].mxu1 }
 0x73a   :  { %v955_v31 = vmul.f32 0.35355338, %v899_v30  ;;  %v2869_v32 = vpop.f32.mrb[25].mxu1 }
 0x73b   :  { %v902_v33 = vpop.f32.mrb[26].mxu1  ;;  %v949_v34 = vpop.f32.mrb[28].mxu0 }
 0x73c   :  { %v956_v35 = vmul.f32 0.35355338, %v949_v34  ;;  %v2870_v37 = vpop.f32.mrb[27].mxu1  ;;  %v2875_v39 = vpop.f32.mrb[29].mxu0  ;;  %v957_v40 = vsel %vm415_vm3, %v955_v31, -inf }
 0x73d   :  { %958 = vmax.xlane.f32.xlu0 %v957_v40  ;;  %v952_v41 = vpop.f32.mrb[30].mxu0 }
 0x73e   :  { %v2876_v42 = vpop.f32.mrb[31].mxu0  ;;  %v960_v43 = vsel %vm415_vm3, %v956_v35, -inf }
 0x73f   :  { %961 = vmax.xlane.f32.xlu1 %v960_v43 }
 0x750   :  { %1029 = vrot.lane.b32.xlu1 %v3642_v28, %s3343_s19 }
 0x754   :  { %1079 = vrot.lane.b32.xlu1 %v3612_v4, %s3344_s21 }
 0x758   :  { %1129 = vrot.lane.b32.xlu1 %v3615_v8, %s3344_s21 }
 0x75c   :  { %1127 = vrot.lane.b32.xlu1 %v3630_v20, %s3344_s21 }
 0x7ca   :  { %v959_v46 = vpop.xlane.xlu0 %958 }
 0x7cb   :  { %v963_v48 = vsub.f32 %v955_v31, %v959_v46 }
 0x7cc   :  { %v962_v50 = vpop.xlane.xlu1 %961 }
 0x7cd   :  { %v965_v51 = vmul.f32 1.442695, %v963_v48  ;;  %v964_v52 = vsub.f32 %v956_v35, %v962_v50 }
 0x7cf   :  { %3112 = vpow2.f32 %v965_v51  ;;  %v967_v53 = vmul.f32 1.442695, %v964_v52 }
 0x7d0   :  { %v1030_v55 = vpop.permute.xlu1 %1029 }
 0x7d1   :  { %3114 = vpow2.f32 %v967_v53  ;;  %v1035_v56 = vsel %vm537_vm4, %v1030_v55, 0 }
 0x7d2   :  { %2884 = vmatpush3.bf16.msra.mxu0 %v1035_v56 }
 0x7d3   :  { %2895 = vmatprep.subr.bf16.mxu0 %v3340_v0 }
 0x7d4   :  { %v1080_v1 = vpop.permute.xlu1 %1079 }
 0x7d8   :  { %v1130_v7 = vpop.permute.xlu1 %1129 }
 0x7d9   :  { %v3113_v4 = vpop.eup %3112  ;;  %v1135_v10 = vsel %vm415_vm3, %v1130_v7, 0  ;;  %v2652_v7 = vld [vmem:[%s4073_s5 + $0x30] sm:$0xff] }
 0x7da   :  { %v969_v8 = vsel %vm415_vm3, %v3113_v4, 0.0 }
 0x7db   :  { %v3115_v58 = vpop.eup %3114  ;;  %970 = vadd.xlane.f32.xlu0 %v969_v8 }
 0x7dc   :  { %v972_v20 = vsel %vm415_vm3, %v3115_v58, 0.0  ;;  %v1128_v13 = vpop.permute.xlu1 %1127 }
 0x7df   :  { %973 = vadd.xlane.f32.xlu0 %v972_v20 }
 0x7f5   :  { %981 = vrot.lane.b32.xlu0 %v3638_v25, %s3343_s19 }
 0x7f9   :  { %1077 = vrot.lane.b32.xlu0 %v3628_v19, %s3344_s21  ;;  %v1085_v19 = vsel %vm415_vm3, %v1080_v1, 0  ;;  %v2650_v1 = vld [vmem:[%s4073_s5 + $0x20] sm:$0xff] }
 0x868   :  { %v971_v59 = vpop.xlane.xlu0 %970 }
 0x869   :  { %3116 = vrcp.f32 %v971_v59 }
 0x86c   :  { %v974_v60 = vpop.xlane.xlu0 %973 }
 0x86d   :  { %3118 = vrcp.f32 %v974_v60 }
 0x870   :  { %v982_v61 = vpop.permute.xlu0 %981 }
 0x871   :  { %v987_v62 = vsel %vm537_vm4, %v982_v61, 0 }
 0x872   :  { %2878 = vmatpush3.bf16.msra.mxu1 %v987_v62 }
 0x873   :  { %v3117_v63 = vpop.eup %3116  ;;  %2889 = vmatprep.subr.bf16.mxu1 %v3340_v0 }
 0x874   :  { %v977_v2 = vmul.f32 %v3117_v63, %v3113_v4  ;;  %v1078_v11 = vpop.permute.xlu0 %1077 }
 0x876   :  { %v979_v3 = vpack.c.bf16 %v977_v2, %v977_v2 }
 0x877   :  { %v3119_v5 = vpop.eup %3118 }
 0x878   :  { %v978_v6 = vmul.f32 %v3119_v5, %v3115_v58  ;;  %2880 = vmatmul.mubr.msk.bf16.vlgmr.msra.gmra.mrb[28].mxu1 %vm415_vm3, %v979_v3 }
 0x879   :  { %2891 = vmatprep.mubr.msk.bf16.mxu1 %vm3341_vm0, %v3340_v0 }
 0x87a   :  { %v980_v9 = vpack.c.bf16 %v978_v6, %v978_v6 }
 0x87b   :  { %2890 = vmatpush3.bf16.xpose.msra.mxu1 %v1085_v19  ;;  %v2653_v19 = vld [vmem:[%s4073_s5 + $0x38] sm:$0xff] }
 0x87c   :  { %2886 = vmatmul.mubr.msk.bf16.vlgmr.msra.gmra.mrb[32].mxu0 %vm415_vm3, %v980_v9  ;;  %2901 = vmatprep.subr.bf16.mxu1 %v3340_v0  ;;  %v1427_v9 = vpack.c.bf16 %v2653_v19, %v2652_v7 }
 0x87d   :  { %2896 = vmatpush3.bf16.xpose.msra.mxu0 %v1135_v10  ;;  %2897 = vmatprep.mubr.msk.bf16.mxu0 %vm3341_vm0, %v3340_v0  ;;  %v1436_v10 = vld [vmem:[#allocation10 + $0x20] sm:$0xff] }
 0x87e   :  { %2907 = vmatprep.subr.bf16.mxu0 %v3340_v0 }
 0x882   :  { %2892 = vmatmul.mubr.msk.bf16.vlgmr.msra.gmra.mrb[32].mxu1 %vm415_vm3, %v1078_v11  ;;  %v1437_v11 = vld [vmem:[#allocation10 + $0x28] sm:$0xff] }
 0x883   :  { %2903 = vmatprep.mubr.msk.bf16.mxu1 %vm3341_vm0, %v3340_v0 }
 0x884   :  { %2898 = vmatmul.mubr.msk.bf16.vlgmr.msra.gmra.mrb[36].mxu0 %vm415_vm3, %v1128_v13  ;;  %v1440_v13 = vpack.c.bf16 %v1437_v11, %v1436_v10  ;;  %v2658_v10 = vld [vmem:[%s4077_s9 + $0x4] sm:$0x7] }
 0x885   :  { %2909 = vmatprep.mubr.msk.bf16.mxu0 %vm3341_vm0, %v3340_v0  ;;  %v1501_v11 = vrot.slane %v2658_v10, %v3574_v38 }
 0x94b   :  { %v1023_v14 = vpop.f32.mrb[28].mxu1 }
 0x94c   :  { %v2881_v17 = vpop.f32.mrb[29].mxu1 }
 0x94d   :  { %v1026_v18 = vpop.f32.mrb[30].mxu1  ;;  %v1439_v17 = vld [vmem:[#allocation10 + $0x38] sm:$0xff] }
 0x94e   :  { %v2882_v22 = vpop.f32.mrb[31].mxu1 }
 0x94f   :  { %v1071_v26 = vpop.f32.mrb[32].mxu0  ;;  %v258_v22 = vld [vmem:[#allocation11] sm:$0xff] }
 0x950   :  { %v3071_v27 = vpack.i.bf16 %v1071_v26, %v1023_v14  ;;  %v2887_v29 = vpop.f32.mrb[33].mxu0  ;;  %v1438_v14 = vld [vmem:[#allocation10 + $0x30] sm:$0xff]  ;;  %v259_v26 = vld [vmem:[#allocation11 + $0x8] sm:$0xff] }
 0x951   :  { %v1074_v30 = vpop.f32.mrb[34].mxu0  ;;  %v1441_v18 = vpack.c.bf16 %v1439_v17, %v1438_v14  ;;  %v261_v29 = vld [vmem:[#allocation11 + $0x18] sm:$0xff]  ;;  %v1546_v14 = vrot.slane %v2658_v10, %v3619_v12 }
 0x952   :  { %v2888_v31 = vpop.f32.mrb[35].mxu0 }
 0x955   :  { %v1121_v32 = vpop.f32.mrb[32].mxu1 }
 0x956   :  { %v1177_v33 = vmul.f32 0.35355338, %v1121_v32  ;;  %v2893_v34 = vpop.f32.mrb[33].mxu1 }
 0x957   :  { %v1124_v35 = vpop.f32.mrb[34].mxu1  ;;  %v1171_v37 = vpop.f32.mrb[36].mxu0 }
 0x958   :  { %v1178_v39 = vmul.f32 0.35355338, %v1171_v37  ;;  %v2894_v40 = vpop.f32.mrb[35].mxu1  ;;  %v2899_v41 = vpop.f32.mrb[37].mxu0  ;;  %v1179_v42 = vsel %vm415_vm3, %v1177_v33, -inf }
 0x959   :  { %1180 = vmax.xlane.f32.xlu0 %v1179_v42  ;;  %v1174_v43 = vpop.f32.mrb[38].mxu0 }
 0x95a   :  { %v2900_v46 = vpop.f32.mrb[39].mxu0  ;;  %v1182_v48 = vsel %vm415_vm3, %v1178_v39, -inf }
 0x95b   :  { %1183 = vmax.xlane.f32.xlu1 %v1182_v48 }
 0x96c   :  { %1251 = vrot.lane.b32.xlu1 %v3642_v28, %s3344_s21 }
 0x970   :  { %3067 = vrot.lane.b32.xlu1 %v3066_v24, %s3335_s30 }
 0x974   :  { %3072 = vrot.lane.b32.xlu1 %v3071_v27, %s3345_s22  ;;  %v262_v27 = vpack.c.bf16 %v259_v26, %v258_v22  ;;  %v1456_v22 = vrot.slane %v2658_v10, %v3572_v36 }
 0x9e6   :  { %v1181_v50 = vpop.xlane.xlu0 %1180 }
 0x9e7   :  { %v1185_v51 = vsub.f32 %v1177_v33, %v1181_v50 }
 0x9e8   :  { %v1184_v52 = vpop.xlane.xlu1 %1183 }
 0x9e9   :  { %v1187_v53 = vmul.f32 1.442695, %v1185_v51  ;;  %v1186_v55 = vsub.f32 %v1178_v39, %v1184_v52 }
 0x9eb   :  { %3120 = vpow2.f32 %v1187_v53  ;;  %v1189_v56 = vmul.f32 1.442695, %v1186_v55 }
 0x9ec   :  { %v1252_v4 = vpop.permute.xlu1 %1251 }
 0x9ed   :  { %3122 = vpow2.f32 %v1189_v56  ;;  %v1257_v8 = vsel %vm537_vm4, %v1252_v4, 0 }
 0x9ee   :  { %2908 = vmatpush3.bf16.msra.mxu0 %v1257_v8 }
 0x9ef   :  { %2921 = vmatprep.subr.bf16.mxu0 %v3340_v0 }
 0x9f0   :  { %v3068_v55 = vpop.permute.xlu1 %3067 }
 0x9f1   :  { %v3070_v4 = vunpack.i.h.bf16 %v3068_v55  ;;  %v3069_v8 = vunpack.i.l.bf16 %v3068_v55 }
 0x9f4   :  { %v3073_v56 = vpop.permute.xlu1 %3072 }
 0x9f5   :  { %v3121_v28 = vpop.eup %3120 }
 0x9f6   :  { %v1191_v16 = vsel %vm415_vm3, %v3121_v28, 0.0 }
 0x9f7   :  { %v3123_v23 = vpop.eup %3122  ;;  %1192 = vadd.xlane.f32.xlu0 %v1191_v16  ;;  %v3074_v16 = vunpack.i.l.bf16 %v3073_v56 }
 0x9f8   :  { %v1194_v24 = vsel %vm415_vm3, %v3123_v23, 0.0 }
 0x9fb   :  { %1195 = vadd.xlane.f32.xlu0 %v1194_v24  ;;  %v2654_v24 = vld [vmem:[%s4074_s6 + $0x20] sm:$0xff] }
 0xa11   :  { %1203 = vrot.lane.b32.xlu0 %v3638_v25, %s3344_s21  ;;  %v2651_v25 = vld [vmem:[%s4073_s5 + $0x28] sm:$0xff]  ;;  %s3346_s5 = smov 24  }
 0xa12   :  { %v1426_v5 = vpack.c.bf16 %v2651_v25, %v2650_v1 }
 0xa84   :  { %v1193_v58 = vpop.xlane.xlu0 %1192 }
 0xa85   :  { %3124 = vrcp.f32 %v1193_v58  ;;  %v2655_v58 = vld [vmem:[%s4074_s6 + $0x28] sm:$0xff] }
 0xa88   :  { %v1196_v20 = vpop.xlane.xlu0 %1195 }
 0xa89   :  { %3126 = vrcp.f32 %v1196_v20  ;;  %v1324_v20 = vsel %vm415_vm3, %v3678_v21, %v3070_v4 }
 0xa8c   :  { %v1204_v59 = vpop.permute.xlu0 %1203 }
 0xa8d   :  { %v1209_v60 = vsel %vm537_vm4, %v1204_v59, 0  ;;  %v1323_v59 = vsel %vm415_vm3, %v3676_v15, %v3069_v8  ;;  %v2657_v15 = vld [vmem:[%s4074_s6 + $0x38] sm:$0xff] }
 0xa8e   :  { %2902 = vmatpush3.bf16.msra.mxu1 %v1209_v60 }
 0xa8f   :  { %v3125_v61 = vpop.eup %3124  ;;  %2913 = vmatprep.subr.bf16.mxu1 %v3340_v0 }
 0xa90   :  { %v1199_v62 = vmul.f32 %v3125_v61, %v3121_v28  ;;  %v3075_v28 = vunpack.i.h.bf16 %v3073_v56 }
 0xa92   :  { %v1201_v63 = vpack.c.bf16 %v1199_v62, %v1199_v62  ;;  %v1326_v62 = vsel %vm1325_vm5, %v1323_v59, %v3074_v16 }
 0xa93   :  { %v3127_v2 = vpop.eup %3126 }
 0xa94   :  { %v1200_v3 = vmul.f32 %v3127_v2, %v3123_v23  ;;  %2904 = vmatmul.mubr.msk.bf16.vlgmr.msra.gmra.mrb[36].mxu1 %vm415_vm3, %v1201_v63  ;;  %v1327_v63 = vsel %vm1325_vm5, %v1324_v20, %v3075_v28  ;;  %v1433_v2 = vpack.c.bf16 %v2655_v58, %v2654_v24 }
 0xa95   :  { %2917 = vmatprep.mubr.msk.bf16.mxu1 %vm3341_vm0, %v3340_v0  ;;  %2914 = vmatpush3.bf16.msra.mxu1 %v262_v27 }
 0xa96   :  { %v1202_v6 = vpack.c.bf16 %v1200_v3, %v1200_v3  ;;  %2915 = vmatprep.subr.bf16.mxu1 %v3340_v0 }
 0xa98   :  { %2910 = vmatmul.mubr.msk.bf16.vlgmr.msra.gmra.mrb[40].mxu0 %vm415_vm3, %v1202_v6 }
 0xa99   :  { %2922 = vmatpush3.bf16.msra.mxu0 %v1426_v5  ;;  %2925 = vmatprep.mubr.msk.bf16.mxu0 %vm3341_vm0, %v3340_v0  ;;  %v2656_v5 = vld [vmem:[%s4074_s6 + $0x30] sm:$0xff] }
 0xa9a   :  { %2923 = vmatprep.subr.bf16.mxu0 %v3340_v0  ;;  %v1434_v21 = vpack.c.bf16 %v2657_v15, %v2656_v5 }
 0xa9d   :  { %2924 = vmatpush3.bf16.msra.mxu0 %v1427_v9 }
 0xa9e   :  { %2937 = vmatprep.subr.bf16.mxu0 %v3340_v0 }
 0xaa0   :  { %2926 = vmatmul.mubr.msk.bf16.vlgmr.msra.gmra.mrb[44].mxu0 %vm137_vm1, %v3584_v47  ;;  %v260_v47 = vld [vmem:[#allocation11 + $0x10] sm:$0xff] }
 0xaa1   :  { %2938 = vmatpush3.bf16.msra.mxu0 %v1440_v13  ;;  %2941 = vmatprep.mubr.msk.bf16.mxu0 %vm3341_vm0, %v3340_v0  ;;  %v263_v30 = vpack.c.bf16 %v261_v29, %v260_v47 }
 0xaa2   :  { %2939 = vmatprep.subr.bf16.mxu0 %v3340_v0 }
 0xaa3   :  { %2916 = vmatpush3.bf16.msra.mxu1 %v263_v30 }
 0xaa4   :  { %2929 = vmatprep.subr.bf16.mxu1 %v3340_v0 }
 0xaa5   :  { %2940 = vmatpush3.bf16.msra.mxu0 %v1441_v18 }
 0xaa6   :  { %2951 = vmatprep.subr.bf16.mxu0 %v3340_v0 }
 0xaa8   :  { %2942 = vmatmul.mubr.msk.bf16.vlgmr.msra.gmra.mrb[48].mxu0 %vm137_vm1, %v3596_v57 }
 0xaa9   :  { %2953 = vmatprep.mubr.msk.bf16.mxu0 %vm3341_vm0, %v3340_v0 }
 0xb67   :  { %v1245_v31 = vpop.f32.mrb[36].mxu1 }
 0xb68   :  { %v2905_v32 = vpop.f32.mrb[37].mxu1 }
 0xb69   :  { %v1248_v33 = vpop.f32.mrb[38].mxu1 }
 0xb6a   :  { %v2906_v34 = vpop.f32.mrb[39].mxu1 }
 0xb6b   :  { %v1293_v35 = vpop.f32.mrb[40].mxu0 }
 0xb6c   :  { %v3076_v37 = vpack.i.bf16 %v1293_v35, %v1245_v31  ;;  %v2911_v39 = vpop.f32.mrb[41].mxu0 }
 0xb6d   :  { %v1296_v40 = vpop.f32.mrb[42].mxu0 }
 0xb6e   :  { %3077 = vrot.lane.b32.xlu0 %v3076_v37, %s3346_s5  ;;  %v2912_v41 = vpop.f32.mrb[43].mxu0 }
 0xb73   :  { %v1491_v42 = vpop.f32.mrb[44].mxu0 }
 0xb74   :  { %v2927_v43 = vpop.f32.mrb[45].mxu0  ;;  %v1492_v32 = vadd.f32 %v1491_v42, %v1456_v22 }
 0xb75   :  { %v1494_v46 = vpop.f32.mrb[46].mxu0 }
 0xb76   :  { %v2928_v48 = vpop.f32.mrb[47].mxu0  ;;  %v1495_v35 = vadd.f32 %v1494_v46, %v1456_v22  ;;  %v3859_v39 = vpack.c.bf16 %v1492_v32, %v1492_v32 }
 0xb78   :  { %v3863_v41 = vpack.c.bf16 %v1495_v35, %v1495_v35 }
 0xb7b   :  { %v1581_v50 = vpop.f32.mrb[48].mxu0 }
 0xb7c   :  { %v2943_v51 = vpop.f32.mrb[49].mxu0  ;;  %v1582_v29 = vadd.f32 %v1581_v50, %v1546_v14 }
 0xb7d   :  { %v1584_v52 = vpop.f32.mrb[50].mxu0 }
 0xb7e   :  { %v2944_v53 = vpop.f32.mrb[51].mxu0  ;;  %v1585_v33 = vadd.f32 %v1584_v52, %v1546_v14  ;;  %v3856_v37 = vpack.c.bf16 %v1582_v29, %v1582_v29 }
 0xb80   :  { %v3861_v40 = vpack.c.bf16 %v1585_v33, %v1585_v33  ;;  %v1716_v42 = vsel %vm537_vm4, %v3856_v37, 0 }
 0xb82   :  { %v1762_v43 = vsel %vm537_vm4, %v3861_v40, 0 }
 0xbe0   :  { %v3078_v23 = vpop.permute.xlu0 %3077 }
 0xbe1   :  { %v3080_v60 = vunpack.i.h.bf16 %v3078_v23  ;;  %v3079_v61 = vunpack.i.l.bf16 %v3078_v23 }
 0xbe3   :  { %v1330_v1 = vsel %vm1328_vm6, %v1327_v63, %v3080_v60  ;;  %v1329_v25 = vsel %vm1328_vm6, %v1326_v62, %v3079_v61 }
 0xbe4   :  { %v1331_v3 = vpack.c.bf16 %v1330_v1, %v1329_v25 }
 0xbe6   :  { %2918 = vmatmul.mubr.msk.bf16.vlgmr.msra.gmra.mrb[40].mxu1 %vm137_vm1, %v1331_v3 }
 0xbe7   :  { %2930 = vmatpush3.bf16.msra.mxu1 %v1433_v2  ;;  %2933 = vmatprep.mubr.msk.bf16.mxu1 %vm3341_vm0, %v3340_v0 }
 0xbe8   :  { %2931 = vmatprep.subr.bf16.mxu1 %v3340_v0 }
 0xbeb   :  { %2932 = vmatpush3.bf16.msra.mxu1 %v1434_v21 }
 0xbec   :  { %2945 = vmatprep.subr.bf16.mxu1 %v3340_v0 }
 0xbee   :  { %2934 = vmatmul.mubr.msk.bf16.vlgmr.msra.gmra.mrb[44].mxu1 %vm137_vm1, %v3596_v57 }
 0xbef   :  { %2947 = vmatprep.mubr.msk.bf16.mxu1 %vm3341_vm0, %v3340_v0 }
 0xcb9   :  { %v3837_v6 = vpop.f32.mrb[40].mxu1 }
 0xcba   :  { %v2919_v7 = vpop.f32.mrb[41].mxu1 }
 0xcbb   :  { %v3839_v19 = vpop.f32.mrb[42].mxu1 }
 0xcbc   :  { %v2920_v9 = vpop.f32.mrb[43].mxu1 }
 0xcc1   :  { %v1536_v13 = vpop.f32.mrb[44].mxu1 }
 0xcc2   :  { %v1537_v17 = vadd.f32 %v1536_v13, %v1501_v11  ;;  %v2935_v57 = vpop.f32.mrb[45].mxu1 }
 0xcc3   :  { %v1539_v18 = vpop.f32.mrb[46].mxu1 }
 0xcc4   :  { %v3847_v26 = vpack.c.bf16 %v1537_v17, %v1537_v17  ;;  %v1540_v27 = vadd.f32 %v1539_v18, %v1501_v11  ;;  %v2936_v47 = vpop.f32.mrb[47].mxu1 }
 0xcc6   :  { %v3849_v30 = vpack.c.bf16 %v1540_v27, %v1540_v27  ;;  %v1598_v31 = vsel %vm415_vm3, %v3847_v26, 0 }
 0xcc7   :  { %2946 = vmatpush3.bf16.xpose.msra.mxu1 %v1598_v31 }
 0xcc8   :  { %v1644_v34 = vsel %vm415_vm3, %v3849_v30, 0  ;;  %2957 = vmatprep.subr.bf16.mxu1 %v3340_v0 }
 0xcc9   :  { %2952 = vmatpush3.bf16.xpose.msra.mxu0 %v1644_v34 }
 0xcca   :  { %2963 = vmatprep.subr.bf16.mxu0 %v3340_v0 }
 0xcce   :  { %2948 = vmatmul.mubr.msk.bf16.vlgmr.msra.gmra.mrb[48].mxu1 %vm415_vm3, %v3859_v39 }
 0xccf   :  { %2958 = vmatpush3.bf16.msra.mxu1 %v1716_v42  ;;  %2959 = vmatprep.mubr.msk.bf16.mxu1 %vm3341_vm0, %v3340_v0 }
 0xcd0   :  { %2954 = vmatmul.mubr.msk.bf16.vlgmr.msra.gmra.mrb[52].mxu0 %vm415_vm3, %v3863_v41  ;;  %2969 = vmatprep.subr.bf16.mxu1 %v3340_v0 }
 0xcd1   :  { %2964 = vmatpush3.bf16.msra.mxu0 %v1762_v43  ;;  %2965 = vmatprep.mubr.msk.bf16.mxu0 %vm3341_vm0, %v3340_v0 }
 0xcd2   :  { %2975 = vmatprep.subr.bf16.mxu0 %v3340_v0 }
 0xda1   :  { %v1634_v46 = vpop.f32.mrb[48].mxu1 }
 0xda2   :  { %v1686_v48 = vmul.f32 0.35355338, %v1634_v46  ;;  %v2949_v50 = vpop.f32.mrb[49].mxu1 }
 0xda3   :  { %v1637_v51 = vpop.f32.mrb[50].mxu1  ;;  %v1680_v52 = vpop.f32.mrb[52].mxu0 }
 0xda4   :  { %v1687_v53 = vmul.f32 0.35355338, %v1680_v52  ;;  %v2950_v55 = vpop.f32.mrb[51].mxu1  ;;  %v2955_v56 = vpop.f32.mrb[53].mxu0  ;;  %v1688_v4 = vsel %vm415_vm3, %v1686_v48, -inf }
 0xda5   :  { %1689 = vmax.xlane.f32.xlu1 %v1688_v4  ;;  %v1683_v8 = vpop.f32.mrb[54].mxu0 }
 0xda6   :  { %v2956_v28 = vpop.f32.mrb[55].mxu0  ;;  %v1691_v16 = vsel %vm415_vm3, %v1687_v53, -inf }
 0xda7   :  { %1692 = vmax.xlane.f32.xlu0 %v1691_v16 }
 0xdb6   :  { %1808 = vrot.lane.b32.xlu1 %v3847_v26, %s3342_s20 }
 0xdba   :  { %1805 = vrot.lane.b32.xlu1 %v3859_v39, %s3342_s20 }
 0xdbe   :  { %1857 = vrot.lane.b32.xlu1 %v3863_v41, %s3342_s20 }
 0xe32   :  { %v1690_v23 = vpop.xlane.xlu1 %1689 }
 0xe33   :  { %v1694_v24 = vsub.f32 %v1686_v48, %v1690_v23 }
 0xe34   :  { %v1693_v58 = vpop.xlane.xlu0 %1692 }
 0xe35   :  { %v1696_v20 = vmul.f32 1.442695, %v1694_v24  ;;  %v1695_v59 = vsub.f32 %v1687_v53, %v1693_v58 }
 0xe36   :  { %v1809_v15 = vpop.permute.xlu1 %1808 }
 0xe37   :  { %3128 = vpow2.f32 %v1696_v20  ;;  %v1698_v60 = vmul.f32 1.442695, %v1695_v59  ;;  %v1814_v9 = vsel %vm415_vm3, %v1809_v15, 0 }
 0xe39   :  { %3130 = vpow2.f32 %v1698_v60 }
 0xe3a   :  { %v1806_v17 = vpop.permute.xlu1 %1805 }
 0xe3e   :  { %v1858_v57 = vpop.permute.xlu1 %1857 }
 0xe41   :  { %v3129_v61 = vpop.eup %3128 }
 0xe42   :  { %v1700_v62 = vsel %vm415_vm3, %v3129_v61, 0.0 }
 0xe43   :  { %v3131_v63 = vpop.eup %3130  ;;  %1701 = vadd.xlane.f32.xlu0 %v1700_v62 }
 0xe44   :  { %v1703_v1 = vsel %vm415_vm3, %v3131_v63, 0.0 }
 0xe47   :  { %1704 = vadd.xlane.f32.xlu0 %v1703_v1 }
 0xe5d   :  { %1860 = vrot.lane.b32.xlu0 %v3849_v30, %s3342_s20 }
 0xed0   :  { %v1702_v25 = vpop.xlane.xlu0 %1701 }
 0xed1   :  { %3132 = vrcp.f32 %v1702_v25 }
 0xed4   :  { %v1705_v2 = vpop.xlane.xlu0 %1704 }
 0xed5   :  { %3134 = vrcp.f32 %v1705_v2 }
 0xed8   :  { %v1861_v11 = vpop.permute.xlu0 %1860 }
 0xed9   :  { %v1866_v14 = vsel %vm415_vm3, %v1861_v11, 0 }
 0xedb   :  { %v3133_v3 = vpop.eup %3132 }
 0xedc   :  { %v1708_v5 = vmul.f32 %v3133_v3, %v3129_v61 }
 0xede   :  { %v1710_v21 = vpack.c.bf16 %v1708_v5, %v1708_v5 }
 0xedf   :  { %v3135_v7 = vpop.eup %3134 }
 0xee0   :  { %v1709_v10 = vmul.f32 %v3135_v7, %v3131_v63  ;;  %2960 = vmatmul.mubr.msk.bf16.vlgmr.msra.gmra.mrb[52].mxu1 %vm415_vm3, %v1710_v21 }
 0xee1   :  { %2970 = vmatpush3.bf16.xpose.msra.mxu1 %v1814_v9  ;;  %2971 = vmatprep.mubr.msk.bf16.mxu1 %vm3341_vm0, %v3340_v0 }
 0xee2   :  { %v1711_v13 = vpack.c.bf16 %v1709_v10, %v1709_v10  ;;  %2981 = vmatprep.subr.bf16.mxu1 %v3340_v0 }
 0xee4   :  { %2966 = vmatmul.mubr.msk.bf16.vlgmr.msra.gmra.mrb[56].mxu0 %vm415_vm3, %v1711_v13 }
 0xee5   :  { %2976 = vmatpush3.bf16.xpose.msra.mxu0 %v1866_v14  ;;  %2977 = vmatprep.mubr.msk.bf16.mxu0 %vm3341_vm0, %v3340_v0 }
 0xee6   :  { %2987 = vmatprep.subr.bf16.mxu0 %v3340_v0 }
 0xee8   :  { %2972 = vmatmul.mubr.msk.bf16.vlgmr.msra.gmra.mrb[56].mxu1 %vm415_vm3, %v1806_v17 }
 0xee9   :  { %2983 = vmatprep.mubr.msk.bf16.mxu1 %vm3341_vm0, %v3340_v0 }
 0xeec   :  { %2978 = vmatmul.mubr.msk.bf16.vlgmr.msra.gmra.mrb[60].mxu0 %vm415_vm3, %v1858_v57 }
 0xeed   :  { %2989 = vmatprep.mubr.msk.bf16.mxu0 %vm3341_vm0, %v3340_v0 }
 0xfb3   :  { %v3907_v18 = vpop.f32.mrb[52].mxu1 }
 0xfb4   :  { %v2961_v22 = vpop.f32.mrb[53].mxu1 }
 0xfb5   :  { %v1755_v27 = vpop.f32.mrb[54].mxu1 }
 0xfb6   :  { %v2962_v47 = vpop.f32.mrb[55].mxu1 }
 0xfb7   :  { %v3909_v29 = vpop.f32.mrb[56].mxu0 }
 0xfb8   :  { %v2967_v31 = vpop.f32.mrb[57].mxu0 }
 0xfb9   :  { %v1801_v32 = vpop.f32.mrb[58].mxu0 }
 0xfba   :  { %v2968_v33 = vpop.f32.mrb[59].mxu0 }
 0xfbb   :  { %v1850_v34 = vpop.f32.mrb[56].mxu1 }
 0xfbc   :  { %v1908_v35 = vmul.f32 0.35355338, %v1850_v34  ;;  %v2973_v42 = vpop.f32.mrb[57].mxu1 }
 0xfbd   :  { %v1853_v43 = vpop.f32.mrb[58].mxu1 }
 0xfbe   :  { %v2974_v46 = vpop.f32.mrb[59].mxu1  ;;  %v1910_v48 = vsel %vm415_vm3, %v1908_v35, -inf }
 0xfbf   :  { %1911 = vmax.xlane.f32.xlu1 %v1910_v48  ;;  %v1902_v50 = vpop.f32.mrb[60].mxu0 }
 0xfc0   :  { %v1909_v51 = vmul.f32 0.35355338, %v1902_v50  ;;  %v2979_v52 = vpop.f32.mrb[61].mxu0 }
 0xfc1   :  { %v1905_v53 = vpop.f32.mrb[62].mxu0 }
 0xfc2   :  { %v2980_v55 = vpop.f32.mrb[63].mxu0  ;;  %v1913_v56 = vsel %vm415_vm3, %v1909_v51, -inf }
 0xfc3   :  { %1914 = vmax.xlane.f32.xlu0 %v1913_v56 }
 0xfd0   :  { %1935 = vrot.lane.b32.xlu1 %v3856_v37, %s3342_s20 }
 0xfd4   :  { %2034 = vrot.lane.b32.xlu1 %v3847_v26, %s3343_s19 }
 0xfd8   :  { %2084 = vrot.lane.b32.xlu1 %v3849_v30, %s3343_s19 }
 0xfdc   :  { %2032 = vrot.lane.b32.xlu1 %v3859_v39, %s3343_s19 }
0x104c   :  { %v1912_v4 = vpop.xlane.xlu1 %1911 }
0x104d   :  { %v1916_v8 = vsub.f32 %v1908_v35, %v1912_v4 }
0x104f   :  { %v1918_v28 = vmul.f32 1.442695, %v1916_v8 }
0x1050   :  { %v1936_v16 = vpop.permute.xlu1 %1935  ;;  %v1915_v23 = vpop.xlane.xlu0 %1914 }
0x1051   :  { %3136 = vpow2.f32 %v1918_v28  ;;  %v1941_v24 = vsel %vm537_vm4, %v1936_v16, 0  ;;  %v1917_v58 = vsub.f32 %v1909_v51, %v1915_v23 }
0x1052   :  { %2982 = vmatpush3.bf16.msra.mxu1 %v1941_v24 }
0x1053   :  { %v1920_v20 = vmul.f32 1.442695, %v1917_v58  ;;  %2993 = vmatprep.subr.bf16.mxu1 %v3340_v0 }
0x1054   :  { %v2035_v5 = vpop.permute.xlu1 %2034 }
0x1055   :  { %3138 = vpow2.f32 %v1920_v20  ;;  %v2040_v9 = vsel %vm415_vm3, %v2035_v5, 0 }
0x1058   :  { %v2085_v11 = vpop.permute.xlu1 %2084 }
0x1059   :  { %v2090_v14 = vsel %vm415_vm3, %v2085_v11, 0 }
0x105b   :  { %v3137_v59 = vpop.eup %3136 }
0x105c   :  { %v1922_v60 = vsel %vm415_vm3, %v3137_v59, 0.0  ;;  %v2033_v17 = vpop.permute.xlu1 %2032 }
0x105d   :  { %1923 = vadd.xlane.f32.xlu0 %v1922_v60 }
0x105f   :  { %v3139_v61 = vpop.eup %3138 }
0x1060   :  { %v1925_v62 = vsel %vm415_vm3, %v3139_v61, 0.0 }
0x1061   :  { %1926 = vadd.xlane.f32.xlu0 %v1925_v62 }
0x1077   :  { %1984 = vrot.lane.b32.xlu0 %v3861_v40, %s3342_s20  ;;  %s3348_s20 = smov [#allocation13]  }
0x107b   :  { %2082 = vrot.lane.b32.xlu0 %v3863_v41, %s3343_s19 }
0x10ea   :  { %v1924_v63 = vpop.xlane.xlu0 %1923 }
0x10eb   :  { %3140 = vrcp.f32 %v1924_v63 }
0x10ee   :  { %v1927_v1 = vpop.xlane.xlu0 %1926 }
0x10ef   :  { %3142 = vrcp.f32 %v1927_v1 }
0x10f2   :  { %v1985_v25 = vpop.permute.xlu0 %1984 }
0x10f3   :  { %v1990_v2 = vsel %vm537_vm4, %v1985_v25, 0 }
0x10f4   :  { %2988 = vmatpush3.bf16.msra.mxu0 %v1990_v2 }
0x10f5   :  { %v3141_v3 = vpop.eup %3140  ;;  %2999 = vmatprep.subr.bf16.mxu0 %v3340_v0 }
0x10f6   :  { %v1930_v15 = vmul.f32 %v3141_v3, %v3137_v59  ;;  %v2083_v57 = vpop.permute.xlu0 %2082 }
0x10f8   :  { %v1932_v21 = vpack.c.bf16 %v1930_v15, %v1930_v15 }
0x10f9   :  { %v3143_v7 = vpop.eup %3142 }
0x10fa   :  { %v1931_v10 = vmul.f32 %v3143_v7, %v3139_v61  ;;  %2984 = vmatmul.mubr.msk.bf16.vlgmr.msra.gmra.mrb[60].mxu1 %vm415_vm3, %v1932_v21 }
0x10fb   :  { %2994 = vmatpush3.bf16.xpose.msra.mxu1 %v2040_v9  ;;  %2995 = vmatprep.mubr.msk.bf16.mxu1 %vm3341_vm0, %v3340_v0 }
0x10fc   :  { %v1933_v13 = vpack.c.bf16 %v1931_v10, %v1931_v10  ;;  %3005 = vmatprep.subr.bf16.mxu1 %v3340_v0 }
0x10fe   :  { %2990 = vmatmul.mubr.msk.bf16.vlgmr.msra.gmra.mrb[64].mxu0 %vm415_vm3, %v1933_v13 }
0x10ff   :  { %3000 = vmatpush3.bf16.xpose.msra.mxu0 %v2090_v14  ;;  %3001 = vmatprep.mubr.msk.bf16.mxu0 %vm3341_vm0, %v3340_v0 }
0x1100   :  { %3011 = vmatprep.subr.bf16.mxu0 %v3340_v0 }
0x1102   :  { %2996 = vmatmul.mubr.msk.bf16.vlgmr.msra.gmra.mrb[64].mxu1 %vm415_vm3, %v2033_v17 }
0x1103   :  { %3007 = vmatprep.mubr.msk.bf16.mxu1 %vm3341_vm0, %v3340_v0 }
0x1106   :  { %3002 = vmatmul.mubr.msk.bf16.vlgmr.msra.gmra.mrb[68].mxu0 %vm415_vm3, %v2083_v57 }
0x1107   :  { %3013 = vmatprep.mubr.msk.bf16.mxu0 %vm3341_vm0, %v3340_v0 }
0x11cd   :  { %v3947_v22 = vpop.f32.mrb[60].mxu1 }
0x11ce   :  { %v2985_v27 = vpop.f32.mrb[61].mxu1 }
0x11cf   :  { %v1980_v47 = vpop.f32.mrb[62].mxu1 }
0x11d0   :  { %v2986_v31 = vpop.f32.mrb[63].mxu1 }
0x11d1   :  { %v3949_v32 = vpop.f32.mrb[64].mxu0 }
0x11d2   :  { %v3081_v33 = vpack.i.bf16 %v3949_v32, %v3947_v22  ;;  %v2991_v34 = vpop.f32.mrb[65].mxu0 }
0x11d3   :  { %v2029_v35 = vpop.f32.mrb[66].mxu0 }
0x11d4   :  { %v2992_v42 = vpop.f32.mrb[67].mxu0 }
0x11d5   :  { %v2076_v43 = vpop.f32.mrb[64].mxu1 }
0x11d6   :  { %v2132_v46 = vmul.f32 0.35355338, %v2076_v43  ;;  %v2997_v48 = vpop.f32.mrb[65].mxu1 }
0x11d7   :  { %v2079_v50 = vpop.f32.mrb[66].mxu1 }
0x11d8   :  { %v2998_v51 = vpop.f32.mrb[67].mxu1  ;;  %v2134_v52 = vsel %vm415_vm3, %v2132_v46, -inf }
0x11d9   :  { %2135 = vmax.xlane.f32.xlu1 %v2134_v52  ;;  %v2126_v53 = vpop.f32.mrb[68].mxu0 }
0x11da   :  { %v2133_v55 = vmul.f32 0.35355338, %v2126_v53  ;;  %v3003_v56 = vpop.f32.mrb[69].mxu0 }
0x11db   :  { %v2129_v4 = vpop.f32.mrb[70].mxu0 }
0x11dc   :  { %v3004_v8 = vpop.f32.mrb[71].mxu0  ;;  %v2137_v28 = vsel %vm415_vm3, %v2133_v55, -inf }
0x11dd   :  { %2138 = vmax.xlane.f32.xlu0 %v2137_v28 }
0x11ea   :  { %2158 = vrot.lane.b32.xlu1 %v3856_v37, %s3343_s19 }
0x11ee   :  { %2256 = vrot.lane.b32.xlu1 %v3847_v26, %s3344_s21 }
0x11f2   :  { %2306 = vrot.lane.b32.xlu1 %v3849_v30, %s3344_s21 }
0x11f6   :  { %2254 = vrot.lane.b32.xlu1 %v3859_v39, %s3344_s21 }
0x1266   :  { %v2136_v16 = vpop.xlane.xlu1 %2135 }
0x1267   :  { %v2140_v23 = vsub.f32 %v2132_v46, %v2136_v16 }
0x1269   :  { %v2142_v24 = vmul.f32 1.442695, %v2140_v23 }
0x126a   :  { %v2159_v58 = vpop.permute.xlu1 %2158  ;;  %v2139_v20 = vpop.xlane.xlu0 %2138 }
0x126b   :  { %3144 = vpow2.f32 %v2142_v24  ;;  %v2164_v59 = vsel %vm537_vm4, %v2159_v58, 0  ;;  %v2141_v60 = vsub.f32 %v2133_v55, %v2139_v20 }
0x126c   :  { %3006 = vmatpush3.bf16.msra.mxu1 %v2164_v59 }
0x126d   :  { %v2144_v61 = vmul.f32 1.442695, %v2141_v60  ;;  %3017 = vmatprep.subr.bf16.mxu1 %v3340_v0 }
0x126e   :  { %v2257_v5 = vpop.permute.xlu1 %2256 }
0x126f   :  { %3146 = vpow2.f32 %v2144_v61  ;;  %v2262_v9 = vsel %vm415_vm3, %v2257_v5, 0 }
0x1275   :  { %v3145_v26 = vpop.eup %3144 }
0x1276   :  { %v2146_v30 = vsel %vm415_vm3, %v3145_v26, 0.0 }
0x1277   :  { %2147 = vadd.xlane.f32.xlu0 %v2146_v30 }
0x1279   :  { %v3147_v62 = vpop.eup %3146 }
0x127a   :  { %v2149_v39 = vsel %vm415_vm3, %v3147_v62, 0.0 }
0x127b   :  { %2150 = vadd.xlane.f32.xlu0 %v2149_v39 }
0x1291   :  { %2206 = vrot.lane.b32.xlu0 %v3861_v40, %s3343_s19  ;;  %s2613_s19 = sshll.u32 %s3348_s20, 4  ;;  %s2614_s19 = int_to_ptr.vmem [resolvable:$true] %s2613_s19 }
0x1292   :  { %p3305_p7 = scmp.lt.s32.totalorder %s2614_s19, %s2614_s19 }
0x1295   :  { %2304 = vrot.lane.b32.xlu0 %v3863_v41, %s3344_s21  ;;  %v2307_v41 = vpop.permute.xlu1 %2306 }
0x1296   :  { %v2312_v13 = vsel %vm415_vm3, %v2307_v41, 0  ;;  %v1446_v41 = vld [vmem:[#allocation11 + $0x38] sm:$0xff] }
0x1299   :  { %v2255_v14 = vpop.permute.xlu1 %2254 }
0x1304   :  { %v2148_v63 = vpop.xlane.xlu0 %2147 }
0x1305   :  { %3148 = vrcp.f32 %v2148_v63 }
0x1308   :  { %v2151_v1 = vpop.xlane.xlu0 %2150 }
0x1309   :  { %3150 = vrcp.f32 %v2151_v1 }
0x130c   :  { %v2207_v25 = vpop.permute.xlu0 %2206 }
0x130d   :  { %v2212_v2 = vsel %vm537_vm4, %v2207_v25, 0 }
0x130e   :  { %3012 = vmatpush3.bf16.msra.mxu0 %v2212_v2 }
0x130f   :  { %v3149_v3 = vpop.eup %3148  ;;  %3023 = vmatprep.subr.bf16.mxu0 %v3340_v0 }
0x1310   :  { %v2154_v15 = vmul.f32 %v3149_v3, %v3145_v26  ;;  %v2305_v17 = vpop.permute.xlu0 %2304 }
0x1312   :  { %v2156_v21 = vpack.c.bf16 %v2154_v15, %v2154_v15 }
0x1313   :  { %v3151_v7 = vpop.eup %3150 }
0x1314   :  { %v2155_v10 = vmul.f32 %v3151_v7, %v3147_v62  ;;  %3008 = vmatmul.mubr.msk.bf16.vlgmr.msra.gmra.mrb[68].mxu1 %vm415_vm3, %v2156_v21  ;;  %v1444_v7 = vld [vmem:[#allocation11 + $0x28] sm:$0xff] }
0x1315   :  { %3018 = vmatpush3.bf16.xpose.msra.mxu1 %v2262_v9  ;;  %3019 = vmatprep.mubr.msk.bf16.mxu1 %vm3341_vm0, %v3340_v0 }
0x1316   :  { %v2157_v11 = vpack.c.bf16 %v2155_v10, %v2155_v10  ;;  %3029 = vmatprep.subr.bf16.mxu1 %v3340_v0  ;;  %v1445_v10 = vld [vmem:[#allocation11 + $0x30] sm:$0xff] }
0x1318   :  { %3014 = vmatmul.mubr.msk.bf16.vlgmr.msra.gmra.mrb[72].mxu0 %vm415_vm3, %v2157_v11  ;;  %v1448_v11 = vpack.c.bf16 %v1446_v41, %v1445_v10 }
0x1319   :  { %3024 = vmatpush3.bf16.xpose.msra.mxu0 %v2312_v13  ;;  %3025 = vmatprep.mubr.msk.bf16.mxu0 %vm3341_vm0, %v3340_v0 }
0x131a   :  { %3035 = vmatprep.subr.bf16.mxu0 %v3340_v0 }
0x131c   :  { %3020 = vmatmul.mubr.msk.bf16.vlgmr.msra.gmra.mrb[72].mxu1 %vm415_vm3, %v2255_v14 }
0x131d   :  { %3031 = vmatprep.mubr.msk.bf16.mxu1 %vm3341_vm0, %v3340_v0 }
0x1320   :  { %3026 = vmatmul.mubr.msk.bf16.vlgmr.msra.gmra.mrb[76].mxu0 %vm415_vm3, %v2305_v17 }
0x1321   :  { %3037 = vmatprep.mubr.msk.bf16.mxu0 %vm3341_vm0, %v3340_v0 }
0x13e7   :  { %v2200_v57 = vpop.f32.mrb[68].mxu1 }
0x13e8   :  { %v3009_v27 = vpop.f32.mrb[69].mxu1 }
0x13e9   :  { %v2203_v47 = vpop.f32.mrb[70].mxu1 }
0x13ea   :  { %v3010_v31 = vpop.f32.mrb[71].mxu1 }
0x13eb   :  { %v2248_v34 = vpop.f32.mrb[72].mxu0 }
0x13ec   :  { %v3086_v35 = vpack.i.bf16 %v2248_v34, %v2200_v57  ;;  %v3015_v42 = vpop.f32.mrb[73].mxu0 }
0x13ed   :  { %v2251_v43 = vpop.f32.mrb[74].mxu0 }
0x13ee   :  { %v3016_v46 = vpop.f32.mrb[75].mxu0 }
0x13ef   :  { %v2298_v48 = vpop.f32.mrb[72].mxu1 }
0x13f0   :  { %v2354_v50 = vmul.f32 0.35355338, %v2298_v48  ;;  %v3021_v51 = vpop.f32.mrb[73].mxu1 }
0x13f1   :  { %v2301_v52 = vpop.f32.mrb[74].mxu1 }
0x13f2   :  { %v3022_v53 = vpop.f32.mrb[75].mxu1  ;;  %v2356_v55 = vsel %vm415_vm3, %v2354_v50, -inf }
0x13f3   :  { %2357 = vmax.xlane.f32.xlu1 %v2356_v55  ;;  %v2348_v56 = vpop.f32.mrb[76].mxu0 }
0x13f4   :  { %v2355_v4 = vmul.f32 0.35355338, %v2348_v56  ;;  %v3027_v8 = vpop.f32.mrb[77].mxu0 }
0x13f5   :  { %v2351_v28 = vpop.f32.mrb[78].mxu0 }
0x13f6   :  { %v3028_v16 = vpop.f32.mrb[79].mxu0  ;;  %v2359_v23 = vsel %vm415_vm3, %v2355_v4, -inf }
0x13f7   :  { %2360 = vmax.xlane.f32.xlu0 %v2359_v23 }
0x1404   :  { %2380 = vrot.lane.b32.xlu1 %v3856_v37, %s3344_s21 }
0x1408   :  { %3082 = vrot.lane.b32.xlu1 %v3081_v33, %s3335_s30 }
0x140c   :  { %3087 = vrot.lane.b32.xlu1 %v3086_v35, %s3345_s22 }
0x1480   :  { %v2358_v24 = vpop.xlane.xlu1 %2357 }
0x1481   :  { %v2362_v58 = vsub.f32 %v2354_v50, %v2358_v24 }
0x1483   :  { %v2364_v20 = vmul.f32 1.442695, %v2362_v58 }
0x1484   :  { %v2381_v59 = vpop.permute.xlu1 %2380  ;;  %v2361_v60 = vpop.xlane.xlu0 %2360 }
0x1485   :  { %3152 = vpow2.f32 %v2364_v20  ;;  %v2386_v61 = vsel %vm537_vm4, %v2381_v59, 0  ;;  %v2363_v26 = vsub.f32 %v2355_v4, %v2361_v60 }
0x1486   :  { %3030 = vmatpush3.bf16.msra.mxu1 %v2386_v61 }
0x1487   :  { %v2366_v30 = vmul.f32 1.442695, %v2363_v26  ;;  %3041 = vmatprep.subr.bf16.mxu1 %v3340_v0 }
0x1488   :  { %v3083_v42 = vpop.permute.xlu1 %3082 }
0x1489   :  { %3154 = vpow2.f32 %v2366_v30  ;;  %v3085_v46 = vunpack.i.h.bf16 %v3083_v42  ;;  %v3084_v48 = vunpack.i.l.bf16 %v3083_v42 }
0x148b   :  { %v2501_v52 = vsel %vm415_vm3, %v3909_v29, %v3085_v46  ;;  %v2500_v53 = vsel %vm415_vm3, %v3907_v18, %v3084_v48  ;;  %v4023_v29 = vld [vmem:[%s4078_s10] sm:$0x7]  ;;  %v2659_v18 = vld [vmem:[%s4078_s10 + $0x4] sm:$0x7]  ;;  %s3347_s10 = smov 32  }
0x148c   :  { %v3088_v43 = vpop.permute.xlu1 %3087  ;;  %v1335_v24 = vrot.slane %v4023_v29, %v3572_v36  ;;  %v2510_v58 = vrot.slane %v2659_v18, %v3572_v36  ;;  %v2586_v42 = vrot.slane %v2659_v18, %v3574_v38  ;;  %v2592_v48 = vrot.slane %v2659_v18, %v3619_v12 }
0x148d   :  { %v3089_v50 = vunpack.i.l.bf16 %v3088_v43  ;;  %v1412_v18 = vrot.slane %v4023_v29, %v3574_v38 }
0x148e   :  { %v1374_v59 = vadd.f32 %v3837_v6, %v1335_v24 }
0x148f   :  { %v3153_v37 = vpop.eup %3152  ;;  %v2502_v8 = vsel %vm1325_vm5, %v2500_v53, %v3089_v50 }
0x1490   :  { %v2368_v22 = vsel %vm415_vm3, %v3153_v37, 0.0 }
0x1491   :  { %2369 = vadd.xlane.f32.xlu0 %v2368_v22 }
0x1493   :  { %v3155_v32 = vpop.eup %3154 }
0x1494   :  { %v2371_v33 = vsel %vm415_vm3, %v3155_v32, 0.0 }
0x1495   :  { %2372 = vadd.xlane.f32.xlu0 %v2371_v33 }
0x14ab   :  { %2428 = vrot.lane.b32.xlu0 %v3861_v40, %s3344_s21  ;;  %v1443_v40 = vld [vmem:[#allocation11 + $0x20] sm:$0xff]  ;;  %s3300_s21 = scalar_lea.vmem %s2614_s19, 256 }
0x14ac   :  { %v1447_v9 = vpack.c.bf16 %v1444_v7, %v1443_v40  ;;  %p3301_p6 = scmp.ne.s32.totalorder %s2614_s19, %s3300_s21  ;;  %p3306_p8 = scmp.lt.s32.totalorder %s3300_s21, %s3300_s21 }
0x14ae   :  { %p3307_p9 = por %p3306_p8, %p3305_p7 }
0x14b0   :  { %p3308_p10 = pnand %p3307_p9, %p3301_p6 }
0x151e   :  { %v2370_v62 = vpop.xlane.xlu0 %2369 }
0x151f   :  { %3156 = vrcp.f32 %v2370_v62 }
0x1522   :  { %v2373_v39 = vpop.xlane.xlu0 %2372 }
0x1523   :  { %3158 = vrcp.f32 %v2373_v39  ;;  %v1380_v39 = vadd.f32 %v1374_v59, %v3586_v49 }
0x1525   :  { %v1382_v6 = vsel %vm137_vm1, %v1380_v39, 0.0 }
0x1526   :  { %v2429_v63 = vpop.permute.xlu0 %2428 }
0x1527   :  { %v2434_v1 = vsel %vm537_vm4, %v2429_v63, 0 }
0x1528   :  { %3036 = vmatpush3.bf16.msra.mxu0 %v2434_v1 }
0x1529   :  { %v3157_v25 = vpop.eup %3156 }
0x152a   :  { %v2376_v2 = vmul.f32 %v3157_v25, %v3153_v37 }
0x152c   :  { %v2378_v3 = vpack.c.bf16 %v2376_v2, %v2376_v2 }
0x152d   :  { %v3159_v5 = vpop.eup %3158 }
0x152e   :  { %v2377_v15 = vmul.f32 %v3159_v5, %v3155_v32  ;;  %3032 = vmatmul.mubr.msk.bf16.vlgmr.msra.gmra.mrb[76].mxu1 %vm415_vm3, %v2378_v3  ;;  %v1377_v32 = vadd.f32 %v3839_v19, %v1335_v24 }
0x152f   :  { %3045 = vmatprep.mubr.msk.bf16.mxu1 %vm3341_vm0, %v3340_v0  ;;  %3042 = vmatpush3.bf16.msra.mxu1 %v1447_v9 }
0x1530   :  { %v2379_v21 = vpack.c.bf16 %v2377_v15, %v2377_v15  ;;  %3043 = vmatprep.subr.bf16.mxu1 %v3340_v0  ;;  %v3090_v0 = vunpack.i.h.bf16 %v3088_v43  ;;  %v1381_v63 = vadd.f32 %v1377_v32, %v3590_v54 }
0x1532   :  { %3038 = vmatmul.mubr.msk.bf16.vlgmr.msra.gmra.mrb[80].mxu0 %vm415_vm3, %v2379_v21  ;;  %v2503_v4 = vsel %vm1325_vm5, %v2501_v52, %v3090_v0  ;;  %v1385_v1 = vsel %vm137_vm1, %v1381_v63, 0.0 }
0x1533   :  { %3044 = vmatpush3.bf16.msra.mxu1 %v1448_v11 }
0x1601   :  { %v2422_v13 = vpop.f32.mrb[76].mxu1 }
0x1602   :  { %v3033_v14 = vpop.f32.mrb[77].mxu1 }
0x1603   :  { %v2425_v17 = vpop.f32.mrb[78].mxu1 }
0x1604   :  { %v3034_v57 = vpop.f32.mrb[79].mxu1 }
0x1605   :  { %v2470_v27 = vpop.f32.mrb[80].mxu0 }
0x1606   :  { %v3091_v47 = vpack.i.bf16 %v2470_v27, %v2422_v13  ;;  %v3039_v31 = vpop.f32.mrb[81].mxu0 }
0x1607   :  { %v2473_v34 = vpop.f32.mrb[82].mxu0 }
0x1608   :  { %3092 = vrot.lane.b32.xlu1 %v3091_v47, %s3346_s5  ;;  %v3040_v35 = vpop.f32.mrb[83].mxu0 }
0x167a   :  { %v3093_v51 = vpop.permute.xlu1 %3092 }
0x167b   :  { %v3095_v55 = vunpack.i.h.bf16 %v3093_v51  ;;  %v3094_v56 = vunpack.i.l.bf16 %v3093_v51 }
0x167d   :  { %v2505_v28 = vsel %vm1328_vm6, %v2503_v4, %v3095_v55  ;;  %v2504_v16 = vsel %vm1328_vm6, %v2502_v8, %v3094_v56 }
0x167e   :  { %v2506_v23 = vpack.c.bf16 %v2505_v28, %v2504_v16 }
0x1680   :  { %3046 = vmatmul.mubr.msk.bf16.vlgmr.msra.gmra.mrb[80].mxu1 %vm137_vm1, %v2506_v23 }
0x1753   :  { %v2548_v20 = vpop.f32.mrb[80].mxu1 }
0x1754   :  { %v2549_v60 = vadd.f32 %v2548_v20, %v2510_v58  ;;  %v3047_v61 = vpop.f32.mrb[81].mxu1 }
0x1755   :  { %v2551_v26 = vpop.f32.mrb[82].mxu1 }
0x1756   :  { %v2552_v30 = vadd.f32 %v2551_v26, %v2510_v58  ;;  %v3048_v37 = vpop.f32.mrb[83].mxu1  ;;  %v2555_v22 = vadd.f32 %v2549_v60, %v3578_v44  ;;  %v1418_v60 = vrot.slane %v4023_v29, %v3619_v12 }
0x1758   :  { %v2557_v33 = vsel %vm137_vm1, %v2555_v22, 0.0  ;;  %v2556_v62 = vadd.f32 %v2552_v30, %v3580_v45 }
0x1759   :  { %2558 = vadd.xlane.f32.xlu0 %v2557_v33 }
0x175a   :  { %v2560_v36 = vsel %vm137_vm1, %v2556_v62, 0.0 }
0x175b   :  { %2561 = vadd.xlane.f32.xlu1 %v2560_v36 }
0x175d   :  { %1383 = vadd.xlane.f32.xlu0 %v1382_v6 }
0x1761   :  { %1386 = vadd.xlane.f32.xlu0 %v1385_v1 }
0x17e6   :  { %v2559_v44 = vpop.xlane.xlu0 %2558 }
0x17e7   :  { %v2563_v19 = vmul.f32 0.03125, %v2559_v44 }
0x17e8   :  { %v2562_v25 = vpop.xlane.xlu1 %2561 }
0x17e9   :  { %v2565_v2 = vsub.f32 %v2555_v22, %v2563_v19  ;;  %v2564_v3 = vmul.f32 0.03125, %v2562_v25 }
0x17ea   :  { %v1384_v45 = vpop.xlane.xlu0 %1383 }
0x17eb   :  { %v2566_v5 = vsub.f32 %v2556_v62, %v2564_v3  ;;  %v1389_v49 = vmul.f32 0.03125, %v1384_v45  ;;  %v2567_v15 = vmul.f32 %v2565_v2, %v2565_v2 }
0x17ed   :  { %v1391_v21 = vsub.f32 %v1380_v39, %v1389_v49  ;;  %v2569_v40 = vsel %vm137_vm1, %v2567_v15, 0.0  ;;  %v2568_v7 = vmul.f32 %v2566_v5, %v2566_v5 }
0x17ee   :  { %2570 = vadd.xlane.f32.xlu0 %v2569_v40  ;;  %v1387_v9 = vpop.xlane.xlu0 %1386 }
0x17ef   :  { %v1390_v54 = vmul.f32 0.03125, %v1387_v9  ;;  %v2572_v10 = vsel %vm137_vm1, %v2568_v7, 0.0  ;;  %v1393_v41 = vmul.f32 %v1391_v21, %v1391_v21 }
0x17f0   :  { %2573 = vadd.xlane.f32.xlu1 %v2572_v10 }
0x17f1   :  { %v1392_v11 = vsub.f32 %v1381_v63, %v1390_v54  ;;  %v1395_v13 = vsel %vm137_vm1, %v1393_v41, 0.0 }
0x17f2   :  { %1396 = vadd.xlane.f32.xlu0 %v1395_v13 }
0x17f3   :  { %v1394_v14 = vmul.f32 %v1392_v11, %v1392_v11 }
0x17f5   :  { %v1398_v17 = vsel %vm137_vm1, %v1394_v14, 0.0 }
0x17f6   :  { %1399 = vadd.xlane.f32.xlu1 %v1398_v17 }
0x187b   :  { %v2571_v57 = vpop.xlane.xlu0 %2570 }
0x187c   :  { %v2575_v27 = vmul.f32 0.03125, %v2571_v57 }
0x187d   :  { %v2574_v47 = vpop.xlane.xlu1 %2573 }
0x187e   :  { %v2577_v31 = vadd.f32 1e-05, %v2575_v27  ;;  %v2576_v34 = vmul.f32 0.03125, %v2574_v47 }
0x187f   :  { %v1397_v56 = vpop.xlane.xlu0 %1396 }
0x1880   :  { %3160 = vrsqrt.f32 %v2577_v31  ;;  %v2578_v35 = vadd.f32 1e-05, %v2576_v34  ;;  %v1401_v8 = vmul.f32 0.03125, %v1397_v56 }
0x1882   :  { %3162 = vrsqrt.f32 %v2578_v35  ;;  %v1403_v16 = vadd.f32 1e-05, %v1401_v8 }
0x1883   :  { %v1400_v4 = vpop.xlane.xlu1 %1399 }
0x1884   :  { %v1402_v28 = vmul.f32 0.03125, %v1400_v4  ;;  %3164 = vrsqrt.f32 %v1403_v16 }
0x1886   :  { %v1404_v23 = vadd.f32 1e-05, %v1402_v28 }
0x1888   :  { %3166 = vrsqrt.f32 %v1404_v23 }
0x188a   :  { %v3161_v43 = vpop.eup %3160 }
0x188b   :  { %v2581_v46 = vmul.f32 %v3161_v43, %v2565_v2 }
0x188c   :  { %v3163_v0 = vpop.eup %3162 }
0x188d   :  { %v2587_v50 = vmul.f32 %v2586_v42, %v2581_v46  ;;  %v2582_v51 = vmul.f32 %v3163_v0, %v2566_v5 }
0x188e   :  { %v3165_v24 = vpop.eup %3164 }
0x188f   :  { %v2593_v52 = vadd.f32 %v2592_v48, %v2587_v50  ;;  %v2588_v53 = vmul.f32 %v2586_v42, %v2582_v51  ;;  %v1407_v20 = vmul.f32 %v3165_v24, %v1391_v21 }
0x1891   :  { %2597 = vrot.lane.b32.xlu0 %v2593_v52, %s3347_s10  ;;  %v2594_v55 = vadd.f32 %v2592_v48, %v2588_v53  ;;  %v1413_v61 = vmul.f32 %v1412_v18, %v1407_v20 }
0x1892   :  { %v3167_v58 = vpop.eup %3166 }
0x1893   :  { %2599 = vrot.lane.b32.xlu1 %v2594_v55, %s3347_s10  ;;  %v1408_v59 = vmul.f32 %v3167_v58, %v1392_v11  ;;  %v1419_v30 = vadd.f32 %v1418_v60, %v1413_v61 }
0x1895   :  { %v1414_v26 = vmul.f32 %v1412_v18, %v1408_v59 }
0x1897   :  { %v1420_v32 = vadd.f32 %v1418_v60, %v1414_v26 }
0x1903   :  { %v2598_v37 = vpop.permute.xlu0 %2597 }
0x1904   :  { %v2603_v22 = vsel %vm137_vm1, %v1419_v30, %v2598_v37 }
0x1905   :  { %v2600_v33 = vpop.permute.xlu1 %2599  ;;  %2606 = vst.msk [vmem:[#allocation13] sm:$0xff] %vm2605_vm7, %v2603_v22 }
0x1906   :  { %v2604_v38 = vsel %vm137_vm1, %v1420_v32, %v2600_v33 }
0x1907   :  { %2607 = vst.msk [vmem:[#allocation13 + $0x8] sm:$0xff] %vm2605_vm7, %v2604_v38 }
0x1908   :  { %3311 = shalt.err (!%p3308_p10)
}
0x1909   :  { %s3312_s27 = scalar_lea.hbm %s4079_s11, 256 }
0x190a   :  { %p3313_p11 = scmp.ne.s32.totalorder %s4079_s11, %s3312_s27  ;;  %p3316_p12 = scmp.lt.u32.totalorder %s3312_s27, %s4079_s11 }
0x190c   :  { %p3318_p13 = pnand %p3316_p12, %p3313_p11 }
0x190e   :  { %3321 = shalt.err (!%p3318_p13)
}
0x190f   :  { %2619 = dma.vmem_to_hbm [thread:$0]  %s2614_s19, 256, %s4079_s11, [#allocation4], %s3334_s29, %s3334_s29, %s3335_s30  }
0x1910   :  { %3330 = dma.done.wait [#allocation4], 256  }
0x1911   :  { %3331 = vsyncadd [#allocation4], 4294967040 }
0x1912   :  { %2623 = vsyncpa [#allocation3], 1 }
0x1913   :  { %2624 = vsyncpa [#allocation6], 1 }
0x1914   :  { %2625 = vsyncpa [#allocation9], 1 }
0x1915   :  { %2626 = vsyncpa [#allocation12], 1 }
0x1916   :  { %2627 = vsyncpa [#allocation4], 1 }

</bundles_post_ra>
